<compile_context>
chip_gen: v7x
topology: tpu7x:2x2x1
jax: 0.10.0
libtpu: 0.0.40
codegen_flags: <defaults>
</compile_context>

<pallas_src>
import jax
import jax.numpy as jnp
import numpy as np
from jax.experimental import pallas as pl
from jax.experimental.pallas import tpu as pltpu


def down_kernel(xa_ref, xb_ref, w1_ref, w2_ref, o_ref):
    # xa_ref: (1, TR, 2, Wo+2, 2*Cin)  pooled-row window of the padded input
    # xb_ref: (1, 4,  2, Wo+2, 2*Cin)  4 pooled rows below the tile (halo)
    # w1_ref: (3, 3, Cin,  Cmid)       HWIO, compute dtype
    # w2_ref: (3, 3, Cmid, Cout)
    # o_ref : (1, TR*Wo, Cout)         spatially-flattened NHWC output tile
    _, TR, _, Wo2, two_cin = xa_ref.shape
    Cin = two_cin // 2
    Wo = Wo2 - 2
    Cmid = w1_ref.shape[3]
    Cout = w2_ref.shape[3]
    R1 = TR + 2                       # conv1 rows: tile rows + 1-row halo each side
    cdt = xa_ref.dtype

    r = pl.program_id(1)
    Ho = pl.num_programs(1) * TR

    # ---- MaxPool2d(2): max over the H-pair dim and over the W-pair lane halves
    x = jnp.concatenate([xa_ref[...], xb_ref[...]], axis=1)   # (1, TR+4, 2, Wo+2, 2*Cin)
    xh = jnp.maximum(x[0, :, 0, :, :], x[0, :, 1, :, :])      # (TR+4, Wo+2, 2*Cin)
    pooled = jnp.maximum(xh[:, :, :Cin], xh[:, :, Cin:])      # (TR+4, Wo+2, Cin)

    # ---- conv1: 3x3, pad=1, no bias, ReLU, on rows [r*TR-1, (r+1)*TR+1) ----
    # 9 shifted-view dots accumulated in f32 (no materialized im2col slab).
    acc1 = jnp.zeros((R1 * Wo, Cmid), jnp.float32)
    for dy in range(3):
        for dx in range(3):
            tap = pooled[dy:dy + R1, dx:dx + Wo, :].reshape(R1 * Wo, Cin)
            acc1 = acc1 + jnp.dot(tap, w1_ref[dy, dx],
                                  preferred_element_type=jnp.float32)
    h1 = jnp.maximum(acc1, 0.0).reshape(R1, Wo, Cmid)
    # Halo rows outside the image are conv2's zero padding, not conv1 outputs.
    row = r * TR + jax.lax.broadcasted_iota(jnp.int32, (R1, 1, 1), 0) - 1
    h1 = jnp.where((row >= 0) & (row < Ho), h1, 0.0).astype(cdt)
    # conv2's column zero padding.
    zcol = jnp.zeros((R1, 1, Cmid), cdt)
    h1p = jnp.concatenate([zcol, h1, zcol], axis=1)           # (R1, Wo+2, Cmid)

    # ---- conv2: 3x3, pad=1, no bias, ReLU ----
    acc2 = jnp.zeros((TR * Wo, Cout), jnp.float32)
    for dy in range(3):
        for dx in range(3):
            tap = h1p[dy:dy + TR, dx:dx + Wo, :].reshape(TR * Wo, Cmid)
            acc2 = acc2 + jnp.dot(tap, w2_ref[dy, dx],
                                  preferred_element_type=jnp.float32)
    h2 = jnp.maximum(acc2, 0.0)                               # (TR*Wo, Cout) f32

    o_ref[...] = h2.reshape(1, TR * Wo, Cout).astype(o_ref.dtype)


def down_forward(x_nchw, w1_hwio, w2_hwio, *, row_tile=None,
                 compute_dtype=jnp.bfloat16):
    """Down.forward: NCHW in -> NCHW out (N, Cout, H//2, W//2)."""
    N, Cin, H, W = x_nchw.shape
    assert H % 8 == 0 and W % 2 == 0, "kernel assumes H % 8 == 0 and even W"
    Ho, Wo = H // 2, W // 2
    Cmid = w1_hwio.shape[-1]
    Cout = w2_hwio.shape[-1]
    itm = jnp.dtype(compute_dtype).itemsize
    out_itm = jnp.dtype(x_nchw.dtype).itemsize

    def _working_set(t):
        in_blocks = 2 * ((t + 4) * 2 * (Wo + 2) * 2 * Cin * itm)   # xa+xb, double buffered
        out_block = 2 * (t * Wo * Cout * out_itm)
        weights = 9 * (Cin * Cmid + Cmid * Cout) * itm
        interm = ((t + 4) * (Wo + 2) * Cin * itm                   # pooled
                  + (t + 2) * Wo * Cmid * (4 + itm)                # conv1 acc + cast
                  + (t + 2) * (Wo + 2) * Cmid * itm                # h1 padded
                  + t * Wo * Cout * 4)                             # conv2 acc
        return in_blocks + out_block + weights + interm

    if row_tile is None:
        cands = [t for t in (32, 16, 8) if Ho % t == 0]            # largest first
        if not cands:
            row_tile = Ho
        else:
            row_tile = cands[-1]
            for t in cands:
                if _working_set(t) <= 24 * 1024 * 1024:
                    row_tile = t
                    break
    assert Ho % row_tile == 0 and row_tile % 4 == 0
    assert row_tile % 8 == 0 or row_tile == Ho, "output row tile must be 8-aligned"
    TR = row_tile
    nR = Ho // TR

    # NCHW -> NHWC (layout boundary); zero-pad 2 pooled rows / 1 pooled column of
    # halo on each side (max-pool of zeros == the convs' zero padding); cast to
    # the MXU compute dtype; contiguous reshape that keeps channels on lanes and
    # exposes the 2x2 pooling pairs.
    x_nhwc = jnp.transpose(x_nchw, (0, 2, 3, 1))
    x_pad = jnp.pad(x_nhwc, ((0, 0), (4, 4), (2, 2), (0, 0))).astype(compute_dtype)
    x6 = x_pad.reshape(N, Ho + 4, 2, Wo + 2, 2 * Cin)

    w1_c = w1_hwio.astype(compute_dtype)      # (3, 3, Cin,  Cmid)
    w2_c = w2_hwio.astype(compute_dtype)      # (3, 3, Cmid, Cout)

    flops = 2 * N * Ho * Wo * 9 * (Cin * Cmid + Cmid * Cout)
    bytes_accessed = int(x6.size * itm + (w1_c.size + w2_c.size) * itm
                         + N * Ho * Wo * Cout * out_itm)
    vmem_limit = int(min(48 * 1024 * 1024,
                         max(32 * 1024 * 1024, 2 * _working_set(TR))))

    out_flat = pl.pallas_call(
        down_kernel,
        out_shape=jax.ShapeDtypeStruct((N, Ho * Wo, Cout), x_nchw.dtype),
        grid=(N, nR),
        in_specs=[
            # main pooled-row window of the tile
            pl.BlockSpec((1, TR, 2, Wo + 2, 2 * Cin),
                         lambda n, r: (n, r, 0, 0, 0)),
            # 4 pooled rows below the tile (last 2 data rows + 2-row bottom halo)
            pl.BlockSpec((1, 4, 2, Wo + 2, 2 * Cin),
                         lambda n, r: (n, (r + 1) * (TR // 4), 0, 0, 0)),
            pl.BlockSpec((3, 3, Cin, Cmid), lambda n, r: (0, 0, 0, 0)),
            pl.BlockSpec((3, 3, Cmid, Cout), lambda n, r: (0, 0, 0, 0)),
        ],
        out_specs=pl.BlockSpec((1, TR * Wo, Cout), lambda n, r: (n, r, 0)),
        compiler_params=pltpu.CompilerParams(
            dimension_semantics=("parallel", "parallel"),
            vmem_limit_bytes=vmem_limit,
        ),
        cost_estimate=pl.CostEstimate(
            flops=flops, transcendentals=0, bytes_accessed=bytes_accessed),
    )(x6, x6, w1_c, w2_c)

    out_nhwc = out_flat.reshape(N, Ho, Wo, Cout)
    return jnp.transpose(out_nhwc, (0, 3, 1, 2))      # NHWC -> NCHW


def down_reference(x_nchw, w1_hwio, w2_hwio):
    """Pure-JAX reference matching PyTorch Down semantics (f32)."""
    N, C, H, W = x_nchw.shape
    pooled = x_nchw.reshape(N, C, H // 2, 2, W // 2, 2).max(axis=(3, 5))
    w1_oihw = jnp.transpose(w1_hwio, (3, 2, 0, 1))
    w2_oihw = jnp.transpose(w2_hwio, (3, 2, 0, 1))
    dn = ("NCHW", "OIHW", "NCHW")
    h = jax.lax.conv_general_dilated(pooled, w1_oihw, (1, 1), "SAME",
                                     dimension_numbers=dn,
                                     precision=jax.lax.Precision.HIGHEST)
    h = jnp.maximum(h, 0.0)
    o = jax.lax.conv_general_dilated(h, w2_oihw, (1, 1), "SAME",
                                     dimension_numbers=dn,
                                     precision=jax.lax.Precision.HIGHEST)
    return jnp.maximum(o, 0.0)


if __name__ == "__main__":
    key = jax.random.PRNGKey(0)
    kx, kw1, kw2, kx2 = jax.random.split(key, 4)

    # Down(in_ch=4, out_ch=8) on input (N=2, C=4, H=16, W=16).
    N, Cin, H, W = 2, 4, 16, 16
    Cmid = Cout = 8                     # DoubleConv mid_ch defaults to out_ch
    x = jax.random.normal(kx, (N, Cin, H, W), dtype=jnp.float32)
    w1 = 0.1 * jax.random.normal(kw1, (3, 3, Cin, Cmid), dtype=jnp.float32)
    w2 = 0.1 * jax.random.normal(kw2, (3, 3, Cmid, Cout), dtype=jnp.float32)

    out = jax.block_until_ready(down_forward(x, w1, w2))
    ref = jax.block_until_ready(down_reference(x, w1, w2))
    assert out.shape == (N, Cout, H // 2, W // 2), out.shape
    # bf16 MXU operands (f32 accumulation) -> loosened tolerance vs f32 reference.
    np.testing.assert_allclose(np.asarray(out), np.asarray(ref),
                               rtol=5e-2, atol=5e-2)

    # Larger spatial input exercising the row-tiled halo path (Ho=16, 2 row tiles).
    x2 = jax.random.normal(kx2, (N, Cin, 32, 32), dtype=jnp.float32)
    out2 = jax.block_until_ready(down_forward(x2, w1, w2, row_tile=8))
    ref2 = jax.block_until_ready(down_reference(x2, w1, w2))
    np.testing.assert_allclose(np.asarray(out2), np.asarray(ref2),
                               rtol=5e-2, atol=5e-2)

    print("KERNEL_OK")
</pallas_src>

<mosaic_0001>
module attributes {stable_mosaic.version = 11 : i64} {
  func.func @down_kernel(%arg0: i32, %arg1: i32, %arg2: memref<1x8x2x10x8xbf16, #tpu.memory_space<vmem>>, %arg3: memref<1x4x2x10x8xbf16, #tpu.memory_space<vmem>>, %arg4: memref<3x3x4x8xbf16, #tpu.memory_space<vmem>>, %arg5: memref<3x3x8x8xbf16, #tpu.memory_space<vmem>>, %arg6: memref<1x64x8xf32, #tpu.memory_space<vmem>>) attributes {dimension_semantics = [#tpu.dimension_semantics<parallel>, #tpu.dimension_semantics<parallel>], iteration_bounds = array<i64: 2, 1>, scalar_prefetch = 0 : i64, scratch_operands = 0 : i64, tpu.core_type = #tpu.core_type<tc>, window_params = [{transform_indices = @transform_0, window_bounds = array<i64: 1, 8, 2, 10, 8>}, {transform_indices = @transform_1, window_bounds = array<i64: 1, 4, 2, 10, 8>}, {pipeline_mode = #tpu.pipeline_mode<synchronous>, transform_indices = @transform_2, window_bounds = array<i64: 3, 3, 4, 8>}, {pipeline_mode = #tpu.pipeline_mode<synchronous>, transform_indices = @transform_3, window_bounds = array<i64: 3, 3, 8, 8>}, {transform_indices = @transform_4, window_bounds = array<i64: 1, 64, 8>}]} {
    %c0 = arith.constant 0 : index
    %c0_0 = arith.constant 0 : index
    %c0_1 = arith.constant 0 : index
    %c0_2 = arith.constant 0 : index
    %c0_3 = arith.constant 0 : index
    %0 = vector.load %arg2[%c0, %c0_0, %c0_1, %c0_2, %c0_3] : memref<1x8x2x10x8xbf16, #tpu.memory_space<vmem>>, vector<1x8x2x10x8xbf16>
    %c0_4 = arith.constant 0 : index
    %c0_5 = arith.constant 0 : index
    %c0_6 = arith.constant 0 : index
    %c0_7 = arith.constant 0 : index
    %c0_8 = arith.constant 0 : index
    %1 = vector.load %arg3[%c0_4, %c0_5, %c0_6, %c0_7, %c0_8] : memref<1x4x2x10x8xbf16, #tpu.memory_space<vmem>>, vector<1x4x2x10x8xbf16>
    %2 = tpu.concatenate %0, %1 in 1 : vector<1x8x2x10x8xbf16>, vector<1x4x2x10x8xbf16> -> vector<1x12x2x10x8xbf16>
    %3 = vector.extract_strided_slice %2 {offsets = [0, 0, 0, 0, 0], sizes = [1, 12, 1, 10, 8], strides = [1, 1, 1, 1, 1]} : vector<1x12x2x10x8xbf16> to vector<1x12x1x10x8xbf16>
    %4 = vector.shape_cast %3 : vector<1x12x1x10x8xbf16> to vector<12x10x8xbf16>
    %5 = vector.extract_strided_slice %2 {offsets = [0, 0, 1, 0, 0], sizes = [1, 12, 1, 10, 8], strides = [1, 1, 1, 1, 1]} : vector<1x12x2x10x8xbf16> to vector<1x12x1x10x8xbf16>
    %6 = vector.shape_cast %5 : vector<1x12x1x10x8xbf16> to vector<12x10x8xbf16>
    %7 = arith.maximumf %4, %6 : vector<12x10x8xbf16>
    %8 = vector.extract_strided_slice %7 {offsets = [0, 0, 0], sizes = [12, 10, 4], strides = [1, 1, 1]} : vector<12x10x8xbf16> to vector<12x10x4xbf16>
    %9 = vector.extract_strided_slice %7 {offsets = [0, 0, 4], sizes = [12, 10, 4], strides = [1, 1, 1]} : vector<12x10x8xbf16> to vector<12x10x4xbf16>
    %10 = arith.maximumf %8, %9 : vector<12x10x4xbf16>
    %cst = arith.constant 0.000000e+00 : f32
    %11 = vector.broadcast %cst : f32 to vector<80x8xf32>
    %12 = vector.extract_strided_slice %10 {offsets = [0, 0, 0], sizes = [10, 8, 4], strides = [1, 1, 1]} : vector<12x10x4xbf16> to vector<10x8x4xbf16>
    %13 = vector.shape_cast %12 : vector<10x8x4xbf16> to vector<80x4xbf16>
    %c0_9 = arith.constant 0 : index
    %c0_10 = arith.constant 0 : index
    %c0_11 = arith.constant 0 : index
    %c0_12 = arith.constant 0 : index
    %14 = vector.load %arg4[%c0_9, %c0_10, %c0_11, %c0_12] : memref<3x3x4x8xbf16, #tpu.memory_space<vmem>>, vector<1x1x4x8xbf16>
    %15 = vector.shape_cast %14 : vector<1x1x4x8xbf16> to vector<4x8xbf16>
    %cst_13 = arith.constant dense<0.000000e+00> : vector<80x8xf32>
    %16 = tpu.matmul %13, %15, %cst_13 {dimension_numbers = #tpu.dot_dimension_numbers<[1], [0], [0], [1], [0, 0, 1, 1], [], []>} : vector<80x4xbf16>, vector<4x8xbf16>, vector<80x8xf32> -> vector<80x8xf32>
    %17 = arith.addf %11, %16 : vector<80x8xf32>
    %18 = vector.extract_strided_slice %10 {offsets = [0, 1, 0], sizes = [10, 8, 4], strides = [1, 1, 1]} : vector<12x10x4xbf16> to vector<10x8x4xbf16>
    %19 = vector.shape_cast %18 : vector<10x8x4xbf16> to vector<80x4xbf16>
    %c0_14 = arith.constant 0 : index
    %c1 = arith.constant 1 : index
    %c0_15 = arith.constant 0 : index
    %c0_16 = arith.constant 0 : index
    %20 = vector.load %arg4[%c0_14, %c1, %c0_15, %c0_16] : memref<3x3x4x8xbf16, #tpu.memory_space<vmem>>, vector<1x1x4x8xbf16>
    %21 = vector.shape_cast %20 : vector<1x1x4x8xbf16> to vector<4x8xbf16>
    %cst_17 = arith.constant dense<0.000000e+00> : vector<80x8xf32>
    %22 = tpu.matmul %19, %21, %cst_17 {dimension_numbers = #tpu.dot_dimension_numbers<[1], [0], [0], [1], [0, 0, 1, 1], [], []>} : vector<80x4xbf16>, vector<4x8xbf16>, vector<80x8xf32> -> vector<80x8xf32>
    %23 = arith.addf %17, %22 : vector<80x8xf32>
    %24 = vector.extract_strided_slice %10 {offsets = [0, 2, 0], sizes = [10, 8, 4], strides = [1, 1, 1]} : vector<12x10x4xbf16> to vector<10x8x4xbf16>
    %25 = vector.shape_cast %24 : vector<10x8x4xbf16> to vector<80x4xbf16>
    %c0_18 = arith.constant 0 : index
    %c2 = arith.constant 2 : index
    %c0_19 = arith.constant 0 : index
    %c0_20 = arith.constant 0 : index
    %26 = vector.load %arg4[%c0_18, %c2, %c0_19, %c0_20] : memref<3x3x4x8xbf16, #tpu.memory_space<vmem>>, vector<1x1x4x8xbf16>
    %27 = vector.shape_cast %26 : vector<1x1x4x8xbf16> to vector<4x8xbf16>
    %cst_21 = arith.constant dense<0.000000e+00> : vector<80x8xf32>
    %28 = tpu.matmul %25, %27, %cst_21 {dimension_numbers = #tpu.dot_dimension_numbers<[1], [0], [0], [1], [0, 0, 1, 1], [], []>} : vector<80x4xbf16>, vector<4x8xbf16>, vector<80x8xf32> -> vector<80x8xf32>
    %29 = arith.addf %23, %28 : vector<80x8xf32>
    %30 = vector.extract_strided_slice %10 {offsets = [1, 0, 0], sizes = [10, 8, 4], strides = [1, 1, 1]} : vector<12x10x4xbf16> to vector<10x8x4xbf16>
    %31 = vector.shape_cast %30 : vector<10x8x4xbf16> to vector<80x4xbf16>
    %c1_22 = arith.constant 1 : index
    %c0_23 = arith.constant 0 : index
    %c0_24 = arith.constant 0 : index
    %c0_25 = arith.constant 0 : index
    %32 = vector.load %arg4[%c1_22, %c0_23, %c0_24, %c0_25] : memref<3x3x4x8xbf16, #tpu.memory_space<vmem>>, vector<1x1x4x8xbf16>
    %33 = vector.shape_cast %32 : vector<1x1x4x8xbf16> to vector<4x8xbf16>
    %cst_26 = arith.constant dense<0.000000e+00> : vector<80x8xf32>
    %34 = tpu.matmul %31, %33, %cst_26 {dimension_numbers = #tpu.dot_dimension_numbers<[1], [0], [0], [1], [0, 0, 1, 1], [], []>} : vector<80x4xbf16>, vector<4x8xbf16>, vector<80x8xf32> -> vector<80x8xf32>
    %35 = arith.addf %29, %34 : vector<80x8xf32>
    %36 = vector.extract_strided_slice %10 {offsets = [1, 1, 0], sizes = [10, 8, 4], strides = [1, 1, 1]} : vector<12x10x4xbf16> to vector<10x8x4xbf16>
    %37 = vector.shape_cast %36 : vector<10x8x4xbf16> to vector<80x4xbf16>
    %c1_27 = arith.constant 1 : index
    %c1_28 = arith.constant 1 : index
    %c0_29 = arith.constant 0 : index
    %c0_30 = arith.constant 0 : index
    %38 = vector.load %arg4[%c1_27, %c1_28, %c0_29, %c0_30] : memref<3x3x4x8xbf16, #tpu.memory_space<vmem>>, vector<1x1x4x8xbf16>
    %39 = vector.shape_cast %38 : vector<1x1x4x8xbf16> to vector<4x8xbf16>
    %cst_31 = arith.constant dense<0.000000e+00> : vector<80x8xf32>
    %40 = tpu.matmul %37, %39, %cst_31 {dimension_numbers = #tpu.dot_dimension_numbers<[1], [0], [0], [1], [0, 0, 1, 1], [], []>} : vector<80x4xbf16>, vector<4x8xbf16>, vector<80x8xf32> -> vector<80x8xf32>
    %41 = arith.addf %35, %40 : vector<80x8xf32>
    %42 = vector.extract_strided_slice %10 {offsets = [1, 2, 0], sizes = [10, 8, 4], strides = [1, 1, 1]} : vector<12x10x4xbf16> to vector<10x8x4xbf16>
    %43 = vector.shape_cast %42 : vector<10x8x4xbf16> to vector<80x4xbf16>
    %c1_32 = arith.constant 1 : index
    %c2_33 = arith.constant 2 : index
    %c0_34 = arith.constant 0 : index
    %c0_35 = arith.constant 0 : index
    %44 = vector.load %arg4[%c1_32, %c2_33, %c0_34, %c0_35] : memref<3x3x4x8xbf16, #tpu.memory_space<vmem>>, vector<1x1x4x8xbf16>
    %45 = vector.shape_cast %44 : vector<1x1x4x8xbf16> to vector<4x8xbf16>
    %cst_36 = arith.constant dense<0.000000e+00> : vector<80x8xf32>
    %46 = tpu.matmul %43, %45, %cst_36 {dimension_numbers = #tpu.dot_dimension_numbers<[1], [0], [0], [1], [0, 0, 1, 1], [], []>} : vector<80x4xbf16>, vector<4x8xbf16>, vector<80x8xf32> -> vector<80x8xf32>
    %47 = arith.addf %41, %46 : vector<80x8xf32>
    %48 = vector.extract_strided_slice %10 {offsets = [2, 0, 0], sizes = [10, 8, 4], strides = [1, 1, 1]} : vector<12x10x4xbf16> to vector<10x8x4xbf16>
    %49 = vector.shape_cast %48 : vector<10x8x4xbf16> to vector<80x4xbf16>
    %c2_37 = arith.constant 2 : index
    %c0_38 = arith.constant 0 : index
    %c0_39 = arith.constant 0 : index
    %c0_40 = arith.constant 0 : index
    %50 = vector.load %arg4[%c2_37, %c0_38, %c0_39, %c0_40] : memref<3x3x4x8xbf16, #tpu.memory_space<vmem>>, vector<1x1x4x8xbf16>
    %51 = vector.shape_cast %50 : vector<1x1x4x8xbf16> to vector<4x8xbf16>
    %cst_41 = arith.constant dense<0.000000e+00> : vector<80x8xf32>
    %52 = tpu.matmul %49, %51, %cst_41 {dimension_numbers = #tpu.dot_dimension_numbers<[1], [0], [0], [1], [0, 0, 1, 1], [], []>} : vector<80x4xbf16>, vector<4x8xbf16>, vector<80x8xf32> -> vector<80x8xf32>
    %53 = arith.addf %47, %52 : vector<80x8xf32>
    %54 = vector.extract_strided_slice %10 {offsets = [2, 1, 0], sizes = [10, 8, 4], strides = [1, 1, 1]} : vector<12x10x4xbf16> to vector<10x8x4xbf16>
    %55 = vector.shape_cast %54 : vector<10x8x4xbf16> to vector<80x4xbf16>
    %c2_42 = arith.constant 2 : index
    %c1_43 = arith.constant 1 : index
    %c0_44 = arith.constant 0 : index
    %c0_45 = arith.constant 0 : index
    %56 = vector.load %arg4[%c2_42, %c1_43, %c0_44, %c0_45] : memref<3x3x4x8xbf16, #tpu.memory_space<vmem>>, vector<1x1x4x8xbf16>
    %57 = vector.shape_cast %56 : vector<1x1x4x8xbf16> to vector<4x8xbf16>
    %cst_46 = arith.constant dense<0.000000e+00> : vector<80x8xf32>
    %58 = tpu.matmul %55, %57, %cst_46 {dimension_numbers = #tpu.dot_dimension_numbers<[1], [0], [0], [1], [0, 0, 1, 1], [], []>} : vector<80x4xbf16>, vector<4x8xbf16>, vector<80x8xf32> -> vector<80x8xf32>
    %59 = arith.addf %53, %58 : vector<80x8xf32>
    %60 = vector.extract_strided_slice %10 {offsets = [2, 2, 0], sizes = [10, 8, 4], strides = [1, 1, 1]} : vector<12x10x4xbf16> to vector<10x8x4xbf16>
    %61 = vector.shape_cast %60 : vector<10x8x4xbf16> to vector<80x4xbf16>
    %c2_47 = arith.constant 2 : index
    %c2_48 = arith.constant 2 : index
    %c0_49 = arith.constant 0 : index
    %c0_50 = arith.constant 0 : index
    %62 = vector.load %arg4[%c2_47, %c2_48, %c0_49, %c0_50] : memref<3x3x4x8xbf16, #tpu.memory_space<vmem>>, vector<1x1x4x8xbf16>
    %63 = vector.shape_cast %62 : vector<1x1x4x8xbf16> to vector<4x8xbf16>
    %cst_51 = arith.constant dense<0.000000e+00> : vector<80x8xf32>
    %64 = tpu.matmul %61, %63, %cst_51 {dimension_numbers = #tpu.dot_dimension_numbers<[1], [0], [0], [1], [0, 0, 1, 1], [], []>} : vector<80x4xbf16>, vector<4x8xbf16>, vector<80x8xf32> -> vector<80x8xf32>
    %65 = arith.addf %59, %64 : vector<80x8xf32>
    %cst_52 = arith.constant 0.000000e+00 : f32
    %66 = vector.broadcast %cst_52 : f32 to vector<80x8xf32>
    %67 = arith.maximumf %65, %66 : vector<80x8xf32>
    %68 = vector.shape_cast %67 : vector<80x8xf32> to vector<10x8x8xf32>
    %c8_i32 = arith.constant 8 : i32
    %69 = arith.muli %arg1, %c8_i32 : i32
    %70 = tpu.iota {dimensions = array<i32: 0>} : vector<10x1x1xi32>
    %71 = vector.broadcast %69 : i32 to vector<10x1x1xi32>
    %72 = arith.addi %71, %70 : vector<10x1x1xi32>
    %c1_i32 = arith.constant 1 : i32
    %73 = vector.broadcast %c1_i32 : i32 to vector<10x1x1xi32>
    %74 = arith.subi %72, %73 : vector<10x1x1xi32>
    %c0_i32 = arith.constant 0 : i32
    %75 = vector.broadcast %c0_i32 : i32 to vector<10x1x1xi32>
    %76 = arith.cmpi sge, %74, %75 : vector<10x1x1xi32>
    %c8_i32_53 = arith.constant 8 : i32
    %77 = vector.broadcast %c8_i32_53 : i32 to vector<10x1x1xi32>
    %78 = arith.cmpi slt, %74, %77 : vector<10x1x1xi32>
    %79 = arith.andi %76, %78 : vector<10x1x1xi1>
    %cst_54 = arith.constant 0.000000e+00 : f32
    %80 = vector.shape_cast %79 : vector<10x1x1xi1> to vector<10x1x1xi1>
    %81 = vector.broadcast %80 : vector<10x1x1xi1> to vector<10x8x8xi1>
    %82 = vector.broadcast %cst_54 : f32 to vector<10x8x8xf32>
    %83 = arith.select %81, %68, %82 : vector<10x8x8xi1>, vector<10x8x8xf32>
    %84 = arith.truncf %83 : vector<10x8x8xf32> to vector<10x8x8xbf16>
    %cst_55 = arith.constant 0.000000e+00 : bf16
    %85 = vector.broadcast %cst_55 : bf16 to vector<10x1x8xbf16>
    %86 = tpu.concatenate %85, %84, %85 in 1 : vector<10x1x8xbf16>, vector<10x8x8xbf16>, vector<10x1x8xbf16> -> vector<10x10x8xbf16>
    %cst_56 = arith.constant 0.000000e+00 : f32
    %87 = vector.broadcast %cst_56 : f32 to vector<64x8xf32>
    %88 = vector.extract_strided_slice %86 {offsets = [0, 0, 0], sizes = [8, 8, 8], strides = [1, 1, 1]} : vector<10x10x8xbf16> to vector<8x8x8xbf16>
    %89 = vector.shape_cast %88 : vector<8x8x8xbf16> to vector<64x8xbf16>
    %c0_57 = arith.constant 0 : index
    %c0_58 = arith.constant 0 : index
    %c0_59 = arith.constant 0 : index
    %c0_60 = arith.constant 0 : index
    %90 = vector.load %arg5[%c0_57, %c0_58, %c0_59, %c0_60] : memref<3x3x8x8xbf16, #tpu.memory_space<vmem>>, vector<1x1x8x8xbf16>
    %91 = vector.shape_cast %90 : vector<1x1x8x8xbf16> to vector<8x8xbf16>
    %cst_61 = arith.constant dense<0.000000e+00> : vector<64x8xf32>
    %92 = tpu.matmul %89, %91, %cst_61 {dimension_numbers = #tpu.dot_dimension_numbers<[1], [0], [0], [1], [0, 0, 1, 1], [], []>} : vector<64x8xbf16>, vector<8x8xbf16>, vector<64x8xf32> -> vector<64x8xf32>
    %93 = arith.addf %87, %92 : vector<64x8xf32>
    %94 = vector.extract_strided_slice %86 {offsets = [0, 1, 0], sizes = [8, 8, 8], strides = [1, 1, 1]} : vector<10x10x8xbf16> to vector<8x8x8xbf16>
    %95 = vector.shape_cast %94 : vector<8x8x8xbf16> to vector<64x8xbf16>
    %c0_62 = arith.constant 0 : index
    %c1_63 = arith.constant 1 : index
    %c0_64 = arith.constant 0 : index
    %c0_65 = arith.constant 0 : index
    %96 = vector.load %arg5[%c0_62, %c1_63, %c0_64, %c0_65] : memref<3x3x8x8xbf16, #tpu.memory_space<vmem>>, vector<1x1x8x8xbf16>
    %97 = vector.shape_cast %96 : vector<1x1x8x8xbf16> to vector<8x8xbf16>
    %cst_66 = arith.constant dense<0.000000e+00> : vector<64x8xf32>
    %98 = tpu.matmul %95, %97, %cst_66 {dimension_numbers = #tpu.dot_dimension_numbers<[1], [0], [0], [1], [0, 0, 1, 1], [], []>} : vector<64x8xbf16>, vector<8x8xbf16>, vector<64x8xf32> -> vector<64x8xf32>
    %99 = arith.addf %93, %98 : vector<64x8xf32>
    %100 = vector.extract_strided_slice %86 {offsets = [0, 2, 0], sizes = [8, 8, 8], strides = [1, 1, 1]} : vector<10x10x8xbf16> to vector<8x8x8xbf16>
    %101 = vector.shape_cast %100 : vector<8x8x8xbf16> to vector<64x8xbf16>
    %c0_67 = arith.constant 0 : index
    %c2_68 = arith.constant 2 : index
    %c0_69 = arith.constant 0 : index
    %c0_70 = arith.constant 0 : index
    %102 = vector.load %arg5[%c0_67, %c2_68, %c0_69, %c0_70] : memref<3x3x8x8xbf16, #tpu.memory_space<vmem>>, vector<1x1x8x8xbf16>
    %103 = vector.shape_cast %102 : vector<1x1x8x8xbf16> to vector<8x8xbf16>
    %cst_71 = arith.constant dense<0.000000e+00> : vector<64x8xf32>
    %104 = tpu.matmul %101, %103, %cst_71 {dimension_numbers = #tpu.dot_dimension_numbers<[1], [0], [0], [1], [0, 0, 1, 1], [], []>} : vector<64x8xbf16>, vector<8x8xbf16>, vector<64x8xf32> -> vector<64x8xf32>
    %105 = arith.addf %99, %104 : vector<64x8xf32>
    %106 = vector.extract_strided_slice %86 {offsets = [1, 0, 0], sizes = [8, 8, 8], strides = [1, 1, 1]} : vector<10x10x8xbf16> to vector<8x8x8xbf16>
    %107 = vector.shape_cast %106 : vector<8x8x8xbf16> to vector<64x8xbf16>
    %c1_72 = arith.constant 1 : index
    %c0_73 = arith.constant 0 : index
    %c0_74 = arith.constant 0 : index
    %c0_75 = arith.constant 0 : index
    %108 = vector.load %arg5[%c1_72, %c0_73, %c0_74, %c0_75] : memref<3x3x8x8xbf16, #tpu.memory_space<vmem>>, vector<1x1x8x8xbf16>
    %109 = vector.shape_cast %108 : vector<1x1x8x8xbf16> to vector<8x8xbf16>
    %cst_76 = arith.constant dense<0.000000e+00> : vector<64x8xf32>
    %110 = tpu.matmul %107, %109, %cst_76 {dimension_numbers = #tpu.dot_dimension_numbers<[1], [0], [0], [1], [0, 0, 1, 1], [], []>} : vector<64x8xbf16>, vector<8x8xbf16>, vector<64x8xf32> -> vector<64x8xf32>
    %111 = arith.addf %105, %110 : vector<64x8xf32>
    %112 = vector.extract_strided_slice %86 {offsets = [1, 1, 0], sizes = [8, 8, 8], strides = [1, 1, 1]} : vector<10x10x8xbf16> to vector<8x8x8xbf16>
    %113 = vector.shape_cast %112 : vector<8x8x8xbf16> to vector<64x8xbf16>
    %c1_77 = arith.constant 1 : index
    %c1_78 = arith.constant 1 : index
    %c0_79 = arith.constant 0 : index
    %c0_80 = arith.constant 0 : index
    %114 = vector.load %arg5[%c1_77, %c1_78, %c0_79, %c0_80] : memref<3x3x8x8xbf16, #tpu.memory_space<vmem>>, vector<1x1x8x8xbf16>
    %115 = vector.shape_cast %114 : vector<1x1x8x8xbf16> to vector<8x8xbf16>
    %cst_81 = arith.constant dense<0.000000e+00> : vector<64x8xf32>
    %116 = tpu.matmul %113, %115, %cst_81 {dimension_numbers = #tpu.dot_dimension_numbers<[1], [0], [0], [1], [0, 0, 1, 1], [], []>} : vector<64x8xbf16>, vector<8x8xbf16>, vector<64x8xf32> -> vector<64x8xf32>
    %117 = arith.addf %111, %116 : vector<64x8xf32>
    %118 = vector.extract_strided_slice %86 {offsets = [1, 2, 0], sizes = [8, 8, 8], strides = [1, 1, 1]} : vector<10x10x8xbf16> to vector<8x8x8xbf16>
    %119 = vector.shape_cast %118 : vector<8x8x8xbf16> to vector<64x8xbf16>
    %c1_82 = arith.constant 1 : index
    %c2_83 = arith.constant 2 : index
    %c0_84 = arith.constant 0 : index
    %c0_85 = arith.constant 0 : index
    %120 = vector.load %arg5[%c1_82, %c2_83, %c0_84, %c0_85] : memref<3x3x8x8xbf16, #tpu.memory_space<vmem>>, vector<1x1x8x8xbf16>
    %121 = vector.shape_cast %120 : vector<1x1x8x8xbf16> to vector<8x8xbf16>
    %cst_86 = arith.constant dense<0.000000e+00> : vector<64x8xf32>
    %122 = tpu.matmul %119, %121, %cst_86 {dimension_numbers = #tpu.dot_dimension_numbers<[1], [0], [0], [1], [0, 0, 1, 1], [], []>} : vector<64x8xbf16>, vector<8x8xbf16>, vector<64x8xf32> -> vector<64x8xf32>
    %123 = arith.addf %117, %122 : vector<64x8xf32>
    %124 = vector.extract_strided_slice %86 {offsets = [2, 0, 0], sizes = [8, 8, 8], strides = [1, 1, 1]} : vector<10x10x8xbf16> to vector<8x8x8xbf16>
    %125 = vector.shape_cast %124 : vector<8x8x8xbf16> to vector<64x8xbf16>
    %c2_87 = arith.constant 2 : index
    %c0_88 = arith.constant 0 : index
    %c0_89 = arith.constant 0 : index
    %c0_90 = arith.constant 0 : index
    %126 = vector.load %arg5[%c2_87, %c0_88, %c0_89, %c0_90] : memref<3x3x8x8xbf16, #tpu.memory_space<vmem>>, vector<1x1x8x8xbf16>
    %127 = vector.shape_cast %126 : vector<1x1x8x8xbf16> to vector<8x8xbf16>
    %cst_91 = arith.constant dense<0.000000e+00> : vector<64x8xf32>
    %128 = tpu.matmul %125, %127, %cst_91 {dimension_numbers = #tpu.dot_dimension_numbers<[1], [0], [0], [1], [0, 0, 1, 1], [], []>} : vector<64x8xbf16>, vector<8x8xbf16>, vector<64x8xf32> -> vector<64x8xf32>
    %129 = arith.addf %123, %128 : vector<64x8xf32>
    %130 = vector.extract_strided_slice %86 {offsets = [2, 1, 0], sizes = [8, 8, 8], strides = [1, 1, 1]} : vector<10x10x8xbf16> to vector<8x8x8xbf16>
    %131 = vector.shape_cast %130 : vector<8x8x8xbf16> to vector<64x8xbf16>
    %c2_92 = arith.constant 2 : index
    %c1_93 = arith.constant 1 : index
    %c0_94 = arith.constant 0 : index
    %c0_95 = arith.constant 0 : index
    %132 = vector.load %arg5[%c2_92, %c1_93, %c0_94, %c0_95] : memref<3x3x8x8xbf16, #tpu.memory_space<vmem>>, vector<1x1x8x8xbf16>
    %133 = vector.shape_cast %132 : vector<1x1x8x8xbf16> to vector<8x8xbf16>
    %cst_96 = arith.constant dense<0.000000e+00> : vector<64x8xf32>
    %134 = tpu.matmul %131, %133, %cst_96 {dimension_numbers = #tpu.dot_dimension_numbers<[1], [0], [0], [1], [0, 0, 1, 1], [], []>} : vector<64x8xbf16>, vector<8x8xbf16>, vector<64x8xf32> -> vector<64x8xf32>
    %135 = arith.addf %129, %134 : vector<64x8xf32>
    %136 = vector.extract_strided_slice %86 {offsets = [2, 2, 0], sizes = [8, 8, 8], strides = [1, 1, 1]} : vector<10x10x8xbf16> to vector<8x8x8xbf16>
    %137 = vector.shape_cast %136 : vector<8x8x8xbf16> to vector<64x8xbf16>
    %c2_97 = arith.constant 2 : index
    %c2_98 = arith.constant 2 : index
    %c0_99 = arith.constant 0 : index
    %c0_100 = arith.constant 0 : index
    %138 = vector.load %arg5[%c2_97, %c2_98, %c0_99, %c0_100] : memref<3x3x8x8xbf16, #tpu.memory_space<vmem>>, vector<1x1x8x8xbf16>
    %139 = vector.shape_cast %138 : vector<1x1x8x8xbf16> to vector<8x8xbf16>
    %cst_101 = arith.constant dense<0.000000e+00> : vector<64x8xf32>
    %140 = tpu.matmul %137, %139, %cst_101 {dimension_numbers = #tpu.dot_dimension_numbers<[1], [0], [0], [1], [0, 0, 1, 1], [], []>} : vector<64x8xbf16>, vector<8x8xbf16>, vector<64x8xf32> -> vector<64x8xf32>
    %141 = arith.addf %135, %140 : vector<64x8xf32>
    %cst_102 = arith.constant 0.000000e+00 : f32
    %142 = vector.broadcast %cst_102 : f32 to vector<64x8xf32>
    %143 = arith.maximumf %141, %142 : vector<64x8xf32>
    %144 = vector.shape_cast %143 : vector<64x8xf32> to vector<1x64x8xf32>
    %c0_103 = arith.constant 0 : index
    %c0_104 = arith.constant 0 : index
    %c0_105 = arith.constant 0 : index
    %145 = vector.load %arg6[%c0_103, %c0_104, %c0_105] : memref<1x64x8xf32, #tpu.memory_space<vmem>>, vector<1x64x8xf32>
    tpu.vector_store %arg6[%c0_103, %c0_104, %c0_105], %144 {strides = array<i32>} : memref<1x64x8xf32, #tpu.memory_space<vmem>>, vector<1x64x8xf32>,
    return
  }
  func.func @transform_0(%arg0: i32, %arg1: i32) -> (i32, i32, i32, i32, i32) {
    %c0_i32 = arith.constant 0 : i32
    %c0_i32_0 = arith.constant 0 : i32
    %c0_i32_1 = arith.constant 0 : i32
    %c0_i32_2 = arith.constant 0 : i32
    return %arg0, %arg1, %c0_i32, %c0_i32_0, %c0_i32_1 : i32, i32, i32, i32, i32
  }
  func.func @transform_1(%arg0: i32, %arg1: i32) -> (i32, i32, i32, i32, i32) {
    %c1_i32 = arith.constant 1 : i32
    %0 = arith.addi %arg1, %c1_i32 : i32
    %c2_i32 = arith.constant 2 : i32
    %1 = arith.muli %0, %c2_i32 : i32
    %c0_i32 = arith.constant 0 : i32
    %c0_i32_0 = arith.constant 0 : i32
    %c0_i32_1 = arith.constant 0 : i32
    %c0_i32_2 = arith.constant 0 : i32
    return %arg0, %1, %c0_i32, %c0_i32_0, %c0_i32_1 : i32, i32, i32, i32, i32
  }
  func.func @transform_2(%arg0: i32, %arg1: i32) -> (i32, i32, i32, i32) {
    %c0_i32 = arith.constant 0 : i32
    %c0_i32_0 = arith.constant 0 : i32
    %c0_i32_1 = arith.constant 0 : i32
    %c0_i32_2 = arith.constant 0 : i32
    %c0_i32_3 = arith.constant 0 : i32
    return %c0_i32, %c0_i32_0, %c0_i32_1, %c0_i32_2 : i32, i32, i32, i32
  }
  func.func @transform_3(%arg0: i32, %arg1: i32) -> (i32, i32, i32, i32) {
    %c0_i32 = arith.constant 0 : i32
    %c0_i32_0 = arith.constant 0 : i32
    %c0_i32_1 = arith.constant 0 : i32
    %c0_i32_2 = arith.constant 0 : i32
    %c0_i32_3 = arith.constant 0 : i32
    return %c0_i32, %c0_i32_0, %c0_i32_1, %c0_i32_2 : i32, i32, i32, i32
  }
  func.func @transform_4(%arg0: i32, %arg1: i32) -> (i32, i32, i32) {
    %c0_i32 = arith.constant 0 : i32
    %c0_i32_0 = arith.constant 0 : i32
    return %arg0, %arg1, %c0_i32 : i32, i32, i32
  }
}

</mosaic_0001>

<bundles_post_ra>
// kernel: tpu_custom_call.1
= control target key start
LH: loop header
LB: loop body
LE: loop exit
PB: predicated region body
PF: predicated region fallthrough
CT: control target
= control target key end

     0   :  { %s3987_s15 = smov 0   ;;  %s3989_s16 = smov 0   ;;  %s5127_s0 = inlined_call_operand.vmem [shape: bf16[2,12,2,10,8], index: 0, kind: input, shape index: {}]   ;;  %s5128_s1 = inlined_call_operand.vmem [shape: bf16[2,12,2,10,8], index: 1, kind: input, shape index: {}]   ;;  %s5129_s2 = inlined_call_operand.vmem [shape: bf16[3,3,4,8], index: 2, kind: input, shape index: {}]   ;;  %s5130_s3 = inlined_call_operand.vmem [shape: bf16[3,3,8,8], index: 3, kind: input, shape index: {}]   ;;  %s5131_s4 = inlined_call_operand.vmem [shape: f32[2,64,8], index: 4, kind: output, shape index: {}]  }
   0x1   :  { %s3991_s17 = smov 0  }
   0x2 LB: > { %s26_s18 = sadd.s32 1, %s3952_s16  ;;  %p3084_p0 = scmp.ge.s32.totalorder %s3956_s17, 1  ;;  %s3956_s17 = sphi %s3991_s17, %s14_s17   ;;  %s3952_s16 = sphi %s3989_s16, %s5141_s16   ;;  %s3948_s15 = sphi %s3987_s15, %s5140_s15  }
   0x3   : > { %p28_p1 = scmp.ge.s32.totalorder %s26_s18, 2  ;;  %p222_p2 = scmp.lt.s32.totalorder %s3956_s17, 3 }
   0x5   : > { %s5143_s18 = smov (%p28_p1, %s26_s18), 0  ;;  %p223_p3 = pnand %p3084_p0, %p222_p2 }
   0x6   : > { %p282_p4 = scmp.lt.s32.totalorder (!%p223_p3), %s3948_s15, 1  ;;  %vm693_vm0 = vcmask (!%p223_p3), 1041408   ;;  %v3958_v0 = vmov (!%p223_p3), 0.0   ;;  %v3120_v1 = vld [vmem:[%s5129_s2 + $0x4] sm:$0x3] (!%p223_p3)  ;;  %s3959_s25 = smov (!%p223_p3), 124  }
   0x7   : > { %226 = sbr.rel (%p223_p3) target bundleno = 978 (0x3d2), region = 36  ;;  %3436 = vmatprep.subr.bf16.mxu0 (!%p223_p3), %v3958_v0  ;;  %3392 = vmatprep.subr.bf16.mxu1 (!%p223_p3), %v3958_v0  ;;  %v4021_v2 = vsel (!%p223_p3), %vm693_vm0, %v3120_v1, 0  ;;  %v3089_v35 = vld [vmem:[%s5129_s2 + $0x2] sm:$0x3] (!%p223_p3)  ;;  %vm3960_vm1 = vmmov (!%p223_p3), 0   ;;  %vm896_vm2 = vcmask (!%p223_p3), 1042432  }
   0x8   : > { %3437 = vmatpush3.bf16.msra.mxu0 (!%p223_p3), %v4021_v2  ;;  %v695_v38 = vsel (!%p223_p3), %vm693_vm0, %v3089_v35, 0  ;;  %3438 = vmatprep.mubr.msk.bf16.mxu0 (!%p223_p3), %vm3960_vm1, %v3958_v0  ;;  %vm897_vm3 = vcmask (!%p223_p3), 1046532   ;;  %vm517_vm4 = vsmask.f32 (!%p223_p3), 3328  ;;  %vm518_vm5 = vsmask.f32 (!%p223_p3), 7440 }
   0x9   : > { %3458 = vmatprep.subr.bf16.mxu0 (!%p223_p3), %v3958_v0  ;;  %3394 = vmatprep.mubr.msk.bf16.mxu1 (!%p223_p3), %vm3960_vm1, %v3958_v0  ;;  %vm4198_vm6 = vmor (!%p223_p3), %vm896_vm2, %vm897_vm3  ;;  %vm677_vm8 = vcmask (!%p223_p3), 31744   ;;  %vm2088_vm9 = vcmask (!%p223_p3), 1043456   ;;  %vm1882_vm10 = vcmask (!%p223_p3), 1040384   ;;  %vm1883_vm11 = vsmask.f32 (!%p223_p3), 256 }
   0xa   : > { %3393 = vmatpush3.bf16.msra.mxu1 (!%p223_p3), %v695_v38  ;;  %vm4206_vm7 = vmor (!%p223_p3), %vm517_vm4, %vm518_vm5  ;;  %vm1895_vm13 = vcmask (!%p223_p3), 1044480   ;;  %vm1896_vm14 = vsmask.f32 (!%p223_p3), 4352 }
   0xb   : > { %3414 = vmatprep.subr.bf16.mxu1 (!%p223_p3), %v3958_v0  ;;  %vm4680_vm12 = vmand (!%p223_p3), %vm1882_vm10, %vm1883_vm11 }
   0xc   : > { %vm4684_vm15 = vmand (!%p223_p3), %vm1895_vm13, %vm1896_vm14 }
   0xe   : > { %s5145_s15 = smov (!%p282_p4, %s3948_s15), 1 }
   0xf   : > { %s3903_s19 = smul.u32 192, %s5145_s15  ;;  %s3292_s20 = sshll.u32 %s5145_s15, 6 }
  0x10   : > { %s321_s23 = scalar_lea.vmem %s5131_s4, %s3292_s20 }
  0x11   : > { %s4018_s24 = scalar_lea.vmem %s5127_s0, %s3903_s19  ;;  %s3291_s26 = sadd.s32 128, %s3903_s19 }
  0x12   : > { %v328_v3 = vld [vmem:[%s4018_s24 + $0x10] sm:$0xf]  ;;  %v330_v4 = vld [vmem:[%s4018_s24 + $0x18] sm:$0xf]  ;;  %v324_v5 = vld [vmem:[%s4018_s24] sm:$0xf]  ;;  %s4076_s29 = scalar_lea.vmem %s5128_s1, %s3291_s26 }
  0x13   : > { %v4027_v6 = vmax.bf16 %v330_v4, %v328_v3  ;;  %v326_v7 = vld [vmem:[%s4018_s24 + $0x8] sm:$0xf]  ;;  %v329_v8 = vld [vmem:[%s4018_s24 + $0x14] sm:$0x1]  ;;  %v331_v9 = vld [vmem:[%s4018_s24 + $0x1c] sm:$0x1] }
  0x14   : > { %v4033_v10 = vmax.bf16 %v326_v7, %v324_v5  ;;  %v325_v11 = vld [vmem:[%s4018_s24 + $0x4] sm:$0x1]  ;;  %v327_v12 = vld [vmem:[%s4018_s24 + $0xc] sm:$0x1]  ;;  %v4039_v13 = vmax.bf16 %v331_v9, %v329_v8  ;;  %v336_v15 = vld [vmem:[%s4018_s24 + $0x30] sm:$0xf] }
  0x15   : > { %424 = vrot.lane.b32.xlu1 %v4027_v6, %s3959_s25  ;;  %v4043_v14 = vmax.bf16 %v327_v12, %v325_v11  ;;  %v338_v16 = vld [vmem:[%s4018_s24 + $0x38] sm:$0xf]  ;;  %v332_v17 = vld [vmem:[%s4018_s24 + $0x20] sm:$0xf]  ;;  %v334_v18 = vld [vmem:[%s4018_s24 + $0x28] sm:$0xf] }
  0x16   : > { %420 = vrot.lane.b32.xlu0 %v4033_v10, %s3959_s25  ;;  %v4051_v19 = vmax.bf16 %v338_v16, %v336_v15  ;;  %v4055_v20 = vmax.bf16 %v334_v18, %v332_v17  ;;  %v344_v21 = vld [vmem:[%s4018_s24 + $0x50] sm:$0xf]  ;;  %v346_v22 = vld [vmem:[%s4018_s24 + $0x58] sm:$0xf]  ;;  %v340_v23 = vld [vmem:[%s4018_s24 + $0x40] sm:$0xf] }
  0x17   : > { %v342_v24 = vld [vmem:[%s4018_s24 + $0x48] sm:$0xf]  ;;  %v4065_v25 = vmax.bf16 %v346_v22, %v344_v21  ;;  %v352_v27 = vld [vmem:[%s4018_s24 + $0x70] sm:$0xf]  ;;  %v354_v28 = vld [vmem:[%s4018_s24 + $0x78] sm:$0xf] }
  0x18   : > { %v4069_v26 = vmax.bf16 %v342_v24, %v340_v23  ;;  %v348_v29 = vld [vmem:[%s4018_s24 + $0x60] sm:$0xf]  ;;  %v350_v30 = vld [vmem:[%s4018_s24 + $0x68] sm:$0xf]  ;;  %v4082_v31 = vmax.bf16 %v354_v28, %v352_v27  ;;  %v360_v32 = vld [vmem:[%s4076_s29 + $0x10] sm:$0xf] }
  0x19   : > { %426 = vrot.lane.b32.xlu1 %v4039_v13, %s3959_s25  ;;  %v4087_v33 = vmax.bf16 %v350_v30, %v348_v29  ;;  %v362_v34 = vld [vmem:[%s4076_s29 + $0x18] sm:$0xf]  ;;  %v356_v36 = vld [vmem:[%s4076_s29] sm:$0xf]  ;;  %v358_v37 = vld [vmem:[%s4076_s29 + $0x8] sm:$0xf] }
  0x1a   : > { %422 = vrot.lane.b32.xlu0 %v4043_v14, %s3959_s25  ;;  %v4102_v39 = vmax.bf16 %v362_v34, %v360_v32  ;;  %v4107_v40 = vmax.bf16 %v358_v37, %v356_v36  ;;  %v333_v41 = vld [vmem:[%s4018_s24 + $0x24] sm:$0x1]  ;;  %v335_v42 = vld [vmem:[%s4018_s24 + $0x2c] sm:$0x1]  ;;  %v364_v43 = vld [vmem:[%s4076_s29 + $0x20] sm:$0xf] }
  0x1b   : > { %v366_v44 = vld [vmem:[%s4076_s29 + $0x28] sm:$0xf]  ;;  %v4115_v45 = vmax.bf16 %v335_v42, %v333_v41  ;;  %v341_v47 = vld [vmem:[%s4018_s24 + $0x44] sm:$0x1]  ;;  %v343_v48 = vld [vmem:[%s4018_s24 + $0x4c] sm:$0x1] }
  0x1c   : > { %v4119_v46 = vmax.bf16 %v366_v44, %v364_v43  ;;  %v337_v49 = vld [vmem:[%s4018_s24 + $0x34] sm:$0x1]  ;;  %v339_v50 = vld [vmem:[%s4018_s24 + $0x3c] sm:$0x1]  ;;  %v4127_v51 = vmax.bf16 %v343_v48, %v341_v47  ;;  %v349_v53 = vld [vmem:[%s4018_s24 + $0x64] sm:$0x1] }
  0x1d   : > { %432 = vrot.lane.b32.xlu1 %v4051_v19, %s3959_s25  ;;  %v4131_v52 = vmax.bf16 %v339_v50, %v337_v49  ;;  %v351_v54 = vld [vmem:[%s4018_s24 + $0x6c] sm:$0x1]  ;;  %v345_v55 = vld [vmem:[%s4018_s24 + $0x54] sm:$0x1]  ;;  %v347_v56 = vld [vmem:[%s4018_s24 + $0x5c] sm:$0x1] }
  0x1e   : > { %428 = vrot.lane.b32.xlu0 %v4055_v20, %s3959_s25  ;;  %v4139_v57 = vmax.bf16 %v351_v54, %v349_v53  ;;  %v4143_v58 = vmax.bf16 %v347_v56, %v345_v55  ;;  %v357_v59 = vld [vmem:[%s4076_s29 + $0x4] sm:$0x1]  ;;  %v359_v60 = vld [vmem:[%s4076_s29 + $0xc] sm:$0x1]  ;;  %v353_v61 = vld [vmem:[%s4018_s24 + $0x74] sm:$0x1] }
  0x1f   : > { %v355_v62 = vld [vmem:[%s4018_s24 + $0x7c] sm:$0x1]  ;;  %v4151_v63 = vmax.bf16 %v359_v60, %v357_v59  ;;  %v365_v3 = vld [vmem:[%s4076_s29 + $0x24] sm:$0x1]  ;;  %v367_v4 = vld [vmem:[%s4076_s29 + $0x2c] sm:$0x1] }
  0x20   : > { %v4155_v1 = vmax.bf16 %v355_v62, %v353_v61  ;;  %v361_v5 = vld [vmem:[%s4076_s29 + $0x14] sm:$0x1]  ;;  %v363_v7 = vld [vmem:[%s4076_s29 + $0x1c] sm:$0x1]  ;;  %v4163_v8 = vmax.bf16 %v367_v4, %v365_v3  ;;  %v368_v15 = vld [vmem:[%s4076_s29 + $0x30] sm:$0xf] }
  0x21   : > { %440 = vrot.lane.b32.xlu1 %v4065_v25, %s3959_s25  ;;  %v4167_v9 = vmax.bf16 %v363_v7, %v361_v5  ;;  %v369_v11 = vld [vmem:[%s4076_s29 + $0x34] sm:$0x1]  ;;  %v371_v12 = vld [vmem:[%s4076_s29 + $0x3c] sm:$0x1]  ;;  %v370_v16 = vld [vmem:[%s4076_s29 + $0x38] sm:$0xf] }
  0x22   : > { %436 = vrot.lane.b32.xlu0 %v4069_v26, %s3959_s25  ;;  %v4175_v17 = vmax.bf16 %v371_v12, %v369_v11  ;;  %v4179_v18 = vmax.bf16 %v370_v16, %v368_v15  ;;  %v516_v5 = vld [vmem:[%s5129_s2] sm:$0x3] }
  0x25   : > { %448 = vrot.lane.b32.xlu1 %v4082_v31, %s3959_s25 }
  0x26   : > { %444 = vrot.lane.b32.xlu0 %v4087_v33, %s3959_s25 }
  0x29   : > { %456 = vrot.lane.b32.xlu1 %v4102_v39, %s3959_s25 }
  0x2a   : > { %452 = vrot.lane.b32.xlu0 %v4107_v40, %s3959_s25 }
  0x2d   : > { %430 = vrot.lane.b32.xlu1 %v4115_v45, %s3959_s25 }
  0x2e   : > { %460 = vrot.lane.b32.xlu0 %v4119_v46, %s3959_s25 }
  0x31   : > { %438 = vrot.lane.b32.xlu1 %v4127_v51, %s3959_s25 }
  0x32   : > { %434 = vrot.lane.b32.xlu0 %v4131_v52, %s3959_s25 }
  0x35   : > { %446 = vrot.lane.b32.xlu1 %v4139_v57, %s3959_s25 }
  0x36   : > { %442 = vrot.lane.b32.xlu0 %v4143_v58, %s3959_s25 }
  0x39   : > { %454 = vrot.lane.b32.xlu1 %v4151_v63, %s3959_s25 }
  0x3a   : > { %450 = vrot.lane.b32.xlu0 %v4155_v1, %s3959_s25 }
  0x3d   : > { %462 = vrot.lane.b32.xlu1 %v4163_v8, %s3959_s25 }
  0x3e   : > { %458 = vrot.lane.b32.xlu0 %v4167_v9, %s3959_s25 }
  0x41   : > { %466 = vrot.lane.b32.xlu1 %v4175_v17, %s3959_s25 }
  0x42   : > { %464 = vrot.lane.b32.xlu0 %v4179_v18, %s3959_s25 }
  0x87   : > { %v425_v21 = vpop.permute.xlu1 %424 }
  0x88   : > { %v4186_v22 = vmax.bf16 %v425_v21, %v4027_v6  ;;  %v421_v23 = vpop.permute.xlu0 %420 }
  0x89   : > { %v4189_v24 = vmax.bf16 %v421_v23, %v4033_v10 }
  0x8a   : > { %v535_v27 = vshrl.u32 %v4186_v22, 16  ;;  %v538_v28 = vshll.u32 %v4186_v22, 16  ;;  %v3111_v44 = vrot.slane %v4186_v22, 9 }
  0x8b   : > { %v521_v29 = vshrl.u32 %v4189_v24, 16  ;;  %v524_v30 = vshll.u32 %v4189_v24, 16  ;;  %v3100_v32 = vcombine.low %v4189_v24, %v4186_v22  ;;  %v427_v6 = vpop.permute.xlu1 %426  ;;  %v3110_v50 = vrot.slane %v4189_v24, 9 }
  0x8c   : > { %v537_v34 = vrot.slane %v535_v27, 4  ;;  %v540_v35 = vrot.slane %v538_v28, 5  ;;  %v495_v10 = vmax.bf16 %v427_v6, %v4039_v13  ;;  %v423_v36 = vpop.permute.xlu0 %422 }
  0x8d   : > { %v523_v37 = vrot.slane %v521_v29, 4  ;;  %v526_v38 = vrot.slane %v524_v30, 5  ;;  %v493_v42 = vmax.bf16 %v423_v36, %v4043_v14  ;;  %v3131_v14 = vld [vmem:[%s5129_s2 + $0x6] sm:$0x3]  ;;  %v811_v29 = vsel %vm693_vm0, %v516_v5, 0 }
  0x8e   : > { %v541_v43 = vor.u32 %v540_v35, %v537_v34  ;;  %v544_v47 = vshll.u32 %v495_v10, 16  ;;  %v905_v48 = vrot.slane %v495_v10, 5  ;;  %v1082_v12 = vsel %vm693_vm0, %v3131_v14, 0 }
  0x8f   : > { %v527_v49 = vor.u32 %v526_v38, %v523_v37  ;;  %v530_v53 = vshll.u32 %v493_v42, 16  ;;  %v901_v54 = vrot.slane %v493_v42, 5  ;;  %v433_v55 = vpop.permute.xlu1 %432 }
  0x90   : > { %v542_v56 = vrot.slane %v541_v43, 4  ;;  %v546_v59 = vrot.slane %v544_v47, 5  ;;  %v4215_v60 = vsel %vm4198_vm6, %v3111_v44, %v905_v48  ;;  %v429_v61 = vpop.permute.xlu0 %428  ;;  %v4231_v16 = vmax.bf16 %v433_v55, %v4051_v19 }
  0x91   : > { %v528_v62 = vrot.slane %v527_v49, 4  ;;  %v532_v3 = vrot.slane %v530_v53, 5  ;;  %v902_v4 = vsel %vm4198_vm6, %v3110_v50, %v901_v54  ;;  %v4234_v23 = vmax.bf16 %v429_v61, %v4055_v20 }
  0x92   : > { %v4224_v7 = vsel %vm4206_vm7, %v542_v56, %v546_v59  ;;  %v3121_v11 = vcombine.low %v902_v4, %v4215_v60  ;;  %v563_v30 = vshrl.u32 %v4231_v16, 16  ;;  %v566_v6 = vshll.u32 %v4231_v16, 16 }
  0x93   : > { %v533_v15 = vsel %vm4206_vm7, %v528_v62, %v532_v3  ;;  %v441_v21 = vpop.permute.xlu1 %440  ;;  %v549_v19 = vshrl.u32 %v4234_v23, 16  ;;  %v552_v20 = vshll.u32 %v4234_v23, 16  ;;  %v3132_v4 = vcombine.low %v4186_v22, %v4234_v23 }
  0x94   : > { %3439 = vmatmul.mubr.msk.bf16.vlgmr.msra.gmra.mrb[0].mxu0 %vm677_vm8, %v3121_v11  ;;  %v437_v27 = vpop.permute.xlu0 %436  ;;  %v3090_v28 = vcombine.low %v533_v15, %v4224_v7  ;;  %v4242_v34 = vmax.bf16 %v441_v21, %v4065_v25  ;;  %v565_v36 = vrot.slane %v563_v30, 4  ;;  %v568_v37 = vrot.slane %v566_v6, 5 }
  0x95   : > { %3459 = vmatpush3.bf16.msra.mxu0 %v1082_v12  ;;  %3460 = vmatprep.mubr.msk.bf16.mxu0 %vm3960_vm1, %v3958_v0  ;;  %v4249_v35 = vmax.bf16 %v437_v27, %v4069_v26  ;;  %v3142_v26 = vld [vmem:[%s5129_s2 + $0x8] sm:$0x3]  ;;  %v551_v43 = vrot.slane %v549_v19, 4  ;;  %v554_v44 = vrot.slane %v552_v20, 5  ;;  %v3112_v11 = vrot.slane %v4234_v23, 9 }
  0x96   : > { %3395 = vmatmul.mubr.msk.bf16.vlgmr.msra.gmra.mrb[0].mxu1 %vm677_vm8, %v3090_v28  ;;  %3480 = vmatprep.subr.bf16.mxu0 %v3958_v0  ;;  %v591_v38 = vshrl.u32 %v4242_v34, 16  ;;  %v594_v42 = vshll.u32 %v4242_v34, 16  ;;  %v1205_v54 = vsel %vm693_vm0, %v3142_v26, 0  ;;  %v569_v59 = vor.u32 %v568_v37, %v565_v36 }
  0x97   : > { %v449_v10 = vpop.permute.xlu1 %448  ;;  %3398 = vmatprep.mubr.msk.bf16.mxu1 %vm3960_vm1, %v3958_v0  ;;  %3415 = vmatpush3.bf16.msra.mxu1 %v811_v29  ;;  %v577_v47 = vshrl.u32 %v4249_v35, 16  ;;  %v580_v48 = vshll.u32 %v4249_v35, 16  ;;  %v555_v3 = vor.u32 %v554_v44, %v551_v43  ;;  %v3113_v21 = vrot.slane %v4231_v16, 9 }
  0x98   : > { %v445_v25 = vpop.permute.xlu0 %444  ;;  %3680 = vmatprep.subr.bf16.mxu1 %v3958_v0  ;;  %v4264_v50 = vmax.bf16 %v449_v10, %v4082_v31  ;;  %v593_v55 = vrot.slane %v591_v38, 4  ;;  %v596_v14 = vrot.slane %v594_v42, 5  ;;  %v3114_v28 = vrot.slane %v4249_v35, 9 }
  0x99   : > { %v4268_v56 = vmax.bf16 %v445_v25, %v4087_v33  ;;  %v579_v61 = vrot.slane %v577_v47, 4  ;;  %v582_v62 = vrot.slane %v580_v48, 5  ;;  %v570_v29 = vrot.slane %v569_v59, 4 }
  0x9a   : > { %v619_v31 = vshrl.u32 %v4264_v50, 16  ;;  %v622_v12 = vshll.u32 %v4264_v50, 16  ;;  %v597_v30 = vor.u32 %v596_v14, %v593_v55  ;;  %v556_v19 = vrot.slane %v555_v3, 4 }
  0x9b   : > { %v457_v49 = vpop.permute.xlu1 %456  ;;  %v605_v27 = vshrl.u32 %v4268_v56, 16  ;;  %v608_v6 = vshll.u32 %v4268_v56, 16  ;;  %v583_v20 = vor.u32 %v582_v62, %v579_v61  ;;  %v3133_v37 = vcombine.low %v4231_v16, %v4249_v35 }
  0x9c   : > { %v453_v53 = vpop.permute.xlu0 %452  ;;  %v4287_v10 = vmax.bf16 %v457_v49, %v4102_v39  ;;  %v3115_v38 = vrot.slane %v4242_v34, 9  ;;  %v4292_v42 = vrot.slane %v619_v31, 4  ;;  %v4294_v26 = vrot.slane %v622_v12, 5 }
  0x9d   : > { %v4301_v39 = vrot.slane %v605_v27, 4  ;;  %v4306_v55 = vrot.slane %v608_v6, 5  ;;  %v4309_v14 = vmax.bf16 %v453_v53, %v4107_v40  ;;  %v584_v59 = vrot.slane %v583_v20, 4 }
  0x9e   : > { %v647_v62 = vshrl.u32 %v4287_v10, 16  ;;  %v3116_v40 = vrot.slane %v4268_v56, 9  ;;  %v650_v53 = vshll.u32 %v4287_v10, 16  ;;  %v3101_v22 = vcombine.low %v4234_v23, %v4231_v16 }
  0x9f   : > { %v431_v5 = vpop.permute.xlu1 %430  ;;  %v3102_v16 = vcombine.low %v4249_v35, %v4242_v34 }
  0xa0   : > { %v497_v15 = vmax.bf16 %v431_v5, %v4115_v45  ;;  %3461 = vmatmul.mubr.msk.bf16.vlgmr.msra.gmra.mrb[0].mxu0 %vm677_vm8, %v3132_v4  ;;  %v4277_v33 = vpop.permute.xlu0 %460 }
  0xa1   : > { %3481 = vmatpush3.bf16.msra.mxu0 %v1205_v54  ;;  %3464 = vmatprep.mubr.msk.bf16.mxu0 %vm3960_vm1, %v3958_v0  ;;  %v598_v54 = vrot.slane %v597_v30, 4 }
  0xa2   : > { %v909_v45 = vrot.slane %v497_v15, 5  ;;  %3502 = vmatprep.subr.bf16.mxu0 %v3958_v0  ;;  %v558_v25 = vshll.u32 %v497_v15, 16 }
  0xa3   : > { %v439_v36 = vpop.permute.xlu1 %438 }
  0xa4   : > { %v4298_v43 = vsel %vm4198_vm6, %v3112_v11, %v909_v45  ;;  %v501_v44 = vmax.bf16 %v439_v36, %v4127_v51  ;;  %v435_v47 = vpop.permute.xlu0 %434  ;;  %v560_v3 = vrot.slane %v558_v25, 5  ;;  %v3118_v45 = vrot.slane %v4309_v14, 9 }
  0xa5   : > { %v3155_v48 = vcombine.low %v4215_v60, %v4298_v43  ;;  %v499_v49 = vmax.bf16 %v435_v47, %v4131_v52  ;;  %v3172_v60 = vld [vmem:[%s5129_s2 + $0xe] sm:$0x3] }
  0xa6   : > { %v917_v61 = vrot.slane %v501_v44, 5  ;;  %v586_v11 = vshll.u32 %v501_v44, 16  ;;  %v4336_v20 = vsel %vm4206_vm7, %v556_v19, %v560_v3  ;;  %v3117_v3 = vrot.slane %v4264_v50, 9 }
  0xa7   : > { %v572_v51 = vshll.u32 %v499_v49, 16  ;;  %v913_v4 = vrot.slane %v499_v49, 5  ;;  %v447_v5 = vpop.permute.xlu1 %446 }
  0xa8   : > { %v4314_v31 = vsel %vm4198_vm6, %v3114_v28, %v917_v61  ;;  %3465 = vmatmul.mubr.msk.bf16.gmra.mrb[4].mxu0 %vm677_vm8, %v3133_v37  ;;  %v443_v52 = vpop.permute.xlu0 %442  ;;  %v505_v12 = vmax.bf16 %v447_v5, %v4139_v57  ;;  %v3134_v57 = vcombine.low %v4242_v34, %v4268_v56  ;;  %v588_v37 = vrot.slane %v586_v11, 5 }
  0xa9   : > { %v574_v15 = vrot.slane %v572_v51, 5  ;;  %v4322_v27 = vsel %vm4198_vm6, %v3113_v21, %v913_v4  ;;  %v503_v30 = vmax.bf16 %v443_v52, %v4143_v58  ;;  %3468 = vmatprep.mubr.msk.bf16.mxu0 %vm3960_vm1, %v3958_v0  ;;  %v633_v4 = vshrl.u32 %v4309_v14, 16 }
  0xaa   : > { %v4329_v28 = vcombine.low %v4298_v43, %v4322_v27  ;;  %v925_v6 = vrot.slane %v505_v12, 5  ;;  %v636_v5 = vshll.u32 %v4309_v14, 16  ;;  %v625_v11 = vor.u32 %v4294_v26, %v4292_v42  ;;  %v3180_v43 = vld [vmem:[%s5129_s2 + $0x10] sm:$0x3] }
  0xab   : > { %v4340_v58 = vsel %vm4206_vm7, %v570_v29, %v574_v15  ;;  %v600_v21 = vshll.u32 %v503_v30, 16  ;;  %v921_v25 = vrot.slane %v503_v30, 5  ;;  %v455_v36 = vpop.permute.xlu1 %454  ;;  %v611_v52 = vor.u32 %v4306_v55, %v4301_v39 }
  0xac   : > { %v4344_v44 = vsel %vm4198_vm6, %v3116_v40, %v925_v6  ;;  %v451_v47 = vpop.permute.xlu0 %450  ;;  %v4348_v49 = vcombine.low %v4336_v20, %v4340_v58  ;;  %v4351_v19 = vmax.bf16 %v455_v36, %v4151_v63  ;;  %v4376_v42 = vsel %vm4206_vm7, %v584_v59, %v588_v37 }
  0xad   : > { %v602_v61 = vrot.slane %v600_v21, 5  ;;  %v4355_v29 = vsel %vm4198_vm6, %v3115_v38, %v921_v25  ;;  %v507_v51 = vmax.bf16 %v451_v47, %v4155_v1  ;;  %v4368_v38 = vmax.bf16 %v4277_v33, %v4119_v46 }
  0xae   : > { %3399 = vmatmul.mubr.msk.bf16.gmra.mrb[4].mxu1 %vm677_vm8, %v4348_v49  ;;  %v933_v63 = vrot.slane %v4351_v19, 5  ;;  %v614_v1 = vshll.u32 %v505_v12, 16  ;;  %v3119_v46 = vrot.slane %v4287_v10, 9  ;;  %v649_v6 = vrot.slane %v647_v62, 4 }
  0xaf   : > { %v929_v40 = vrot.slane %v507_v51, 5  ;;  %3402 = vmatprep.mubr.msk.bf16.mxu1 %vm3960_vm1, %v3958_v0  ;;  %v463_v15 = vpop.permute.xlu1 %462  ;;  %v4389_v55 = vsel %vm4206_vm7, %v598_v54, %v602_v61  ;;  %v628_v12 = vshll.u32 %v507_v51, 16  ;;  %v638_v21 = vrot.slane %v636_v5, 5 }
  0xb0   : > { %3469 = vmatmul.mubr.msk.bf16.gmra.mrb[8].mxu0 %vm677_vm8, %v3134_v57  ;;  %v4381_v26 = vsel %vm4198_vm6, %v3118_v45, %v933_v63  ;;  %v459_v33 = vpop.permute.xlu0 %458  ;;  %v4385_v39 = vmax.bf16 %v463_v15, %v4163_v8  ;;  %v652_v57 = vrot.slane %v650_v53, 5  ;;  %v635_v45 = vrot.slane %v633_v4, 4 }
  0xb1   : > { %v4393_v59 = vsel %vm4198_vm6, %v3117_v3, %v929_v40  ;;  %v511_v30 = vmax.bf16 %v459_v33, %v4167_v9  ;;  %3472 = vmatprep.mubr.msk.bf16.mxu0 %vm3960_vm1, %v3958_v0  ;;  %v612_v8 = vrot.slane %v611_v52, 4  ;;  %v616_v25 = vrot.slane %v614_v1, 5 }
  0xb2   : > { %v3153_v54 = vrot.slane %v4368_v38, 9  ;;  %v4401_v47 = vcombine.low %v4376_v42, %v4389_v55  ;;  %v1293_v61 = vrot.slane %v4385_v39, 5  ;;  %v3135_v9 = vcombine.low %v4264_v50, %v4309_v14 }
  0xb3   : > { %v937_v36 = vrot.slane %v511_v30, 5  ;;  %v467_v37 = vpop.permute.xlu1 %466  ;;  %v626_v3 = vrot.slane %v625_v11, 4  ;;  %v630_v51 = vrot.slane %v628_v12, 5  ;;  %v617_v63 = vsel %vm4206_vm7, %v612_v8, %v616_v25 }
  0xb4   : > { %v4407_v62 = vmax.bf16 %v467_v37, %v4175_v17  ;;  %v465_v53 = vpop.permute.xlu0 %464  ;;  %v639_v52 = vor.u32 %v638_v21, %v635_v45  ;;  %v653_v1 = vor.u32 %v652_v57, %v649_v6  ;;  %v642_v17 = vshll.u32 %v4351_v19, 16 }
  0xb5   : > { %v4411_v4 = vsel %vm4198_vm6, %v3119_v46, %v937_v36  ;;  %v4414_v5 = vmax.bf16 %v465_v53, %v4179_v18  ;;  %v4425_v11 = vsel %vm4198_vm6, %v3153_v54, %v1293_v61  ;;  %v631_v15 = vsel %vm4206_vm7, %v626_v3, %v630_v51  ;;  %v3154_v51 = vld [vmem:[%s5129_s2 + $0xa] sm:$0x3] }
  0xb6   : > { %3403 = vmatmul.mubr.msk.bf16.gmra.mrb[8].mxu1 %vm677_vm8, %v4401_v47  ;;  %v1608_v18 = vrot.slane %v4407_v62, 5  ;;  %v656_v46 = vshll.u32 %v511_v30, 16  ;;  %v3156_v19 = vcombine.low %v4322_v27, %v4314_v31  ;;  %v4438_v33 = vcombine.low %v4314_v31, %v4355_v29 }
  0xb7   : > { %3406 = vmatprep.mubr.msk.bf16.mxu1 %vm3960_vm1, %v3958_v0  ;;  %v3179_v40 = vrot.slane %v4414_v5, 9  ;;  %v3157_v12 = vcombine.low %v4355_v29, %v4344_v44  ;;  %v4444_v6 = vcombine.low %v4344_v44, %v4393_v59  ;;  %v3158_v30 = vcombine.low %v4393_v59, %v4381_v26 }
  0xb8   : > { %3473 = vmatmul.mubr.msk.bf16.gmra.mrb[12].mxu0 %vm677_vm8, %v3135_v9  ;;  %v4450_v57 = vcombine.low %v4381_v26, %v4411_v4  ;;  %v3159_v45 = vcombine.low %v4411_v4, %v4425_v11  ;;  %v640_v21 = vrot.slane %v639_v52, 4  ;;  %v4454_v8 = vcombine.low %v617_v63, %v631_v15 }
  0xb9   : > { %3476 = vmatprep.mubr.msk.bf16.mxu0 %vm3960_vm1, %v3958_v0  ;;  %v3136_v25 = vcombine.low %v4287_v10, %v4368_v38  ;;  %v4460_v36 = vsel %vm4198_vm6, %v3179_v40, %v1608_v18  ;;  %v644_v54 = vrot.slane %v642_v17, 5  ;;  %v654_v37 = vrot.slane %v653_v1, 4 }
  0xba   : > { %v658_v61 = vrot.slane %v656_v46, 5  ;;  %v3181_v9 = vcombine.low %v4425_v11, %v4460_v36  ;;  %v3143_v1 = vcombine.low %v4224_v7, %v4336_v20  ;;  %v1319_v17 = vsel %vm693_vm0, %v3154_v51, 0 }
  0xbb   : > { %v645_v53 = vsel %vm4206_vm7, %v640_v21, %v644_v54  ;;  %v3144_v7 = vcombine.low %v4340_v58, %v4376_v42  ;;  %v1168_v20 = vshrl.u32 %v4368_v38, 16  ;;  %v1171_v18 = vshll.u32 %v4368_v38, 16 }
  0xbc   : > { %v659_v3 = vsel %vm4206_vm7, %v654_v37, %v658_v61  ;;  %v3145_v24 = vcombine.low %v4389_v55, %v617_v63  ;;  %v1177_v42 = vshll.u32 %v4385_v39, 16  ;;  %v3146_v23 = vcombine.low %v631_v15, %v645_v53  ;;  %v3165_v39 = vld [vmem:[%s5129_s2 + $0xc] sm:$0x3] }
  0xbd   : > { %v4478_v52 = vcombine.low %v645_v53, %v659_v3  ;;  %v1173_v58 = vrot.slane %v1171_v18, 5  ;;  %v3103_v34 = vcombine.low %v4268_v56, %v4264_v50  ;;  %v3104_v15 = vcombine.low %v4309_v14, %v4287_v10  ;;  %v1908_v53 = vld [vmem:[%s5130_s3] sm:$0xf] }
  0xbe   : > { %3407 = vmatmul.mubr.msk.bf16.gmra.mrb[12].mxu1 %vm677_vm8, %v4454_v8  ;;  %v1179_v63 = vrot.slane %v1177_v42, 5  ;;  %v1413_v50 = vsel %vm693_vm0, %v3165_v39, 0  ;;  %v1520_v56 = vsel %vm693_vm0, %v3172_v60, 0  ;;  %v3166_v10 = vcombine.low %v4368_v38, %v4414_v5 }
  0xbf   : > { %3410 = vmatprep.mubr.msk.bf16.mxu1 %vm3960_vm1, %v3958_v0  ;;  %v1499_v14 = vshrl.u32 %v4414_v5, 16  ;;  %v1502_v31 = vshll.u32 %v4414_v5, 16 }
  0xc0   : > { %3477 = vmatmul.mubr.msk.bf16.gmra.mrb[16].mxu0 %vm677_vm8, %v3136_v25  ;;  %v3203_v25 = vld [vmem:[%s5130_s3 + $0x4] sm:$0xf] }
  0xc1   : > { %3482 = vmatprep.mubr.msk.bf16.mxu0 %vm3960_vm1, %v3958_v0  ;;  %v1501_v27 = vrot.slane %v1499_v14, 4  ;;  %v1504_v44 = vrot.slane %v1502_v31, 5  ;;  %v2090_v36 = vsel %vm2088_vm9, %v3203_v25, 0 }
  0xc3   : > { %v1505_v29 = vor.u32 %v1504_v44, %v1501_v27 }
  0xc5   : > { %v1506_v26 = vrot.slane %v1505_v29, 4 }
  0xc6   : > { %3411 = vmatmul.mubr.msk.bf16.gmra.mrb[16].mxu1 %vm677_vm8, %v4478_v52 }
  0xc7   : > { %3416 = vmatprep.mubr.msk.bf16.mxu1 %vm3960_vm1, %v3958_v0 }
  0xc8   : > { %3483 = vmatmul.mubr.msk.bf16.vlgmr.msra.gmra.mrb[0].mxu0 %vm677_vm8, %v3143_v1 }
  0xc9   : > { %3503 = vmatpush3.bf16.msra.mxu0 %v1319_v17  ;;  %3486 = vmatprep.mubr.msk.bf16.mxu0 %vm3960_vm1, %v3958_v0 }
  0xca   : > { %3524 = vmatprep.subr.bf16.mxu0 %v3958_v0 }
  0xce   : > { %3417 = vmatmul.mubr.msk.bf16.vlgmr.msra.gmra.mrb[0].mxu1 %vm677_vm8, %v3100_v32  ;;  %v1170_v32 = vrot.slane %v1168_v20, 4 }
  0xcf   : > { %3420 = vmatprep.mubr.msk.bf16.mxu1 %vm3960_vm1, %v3958_v0  ;;  %3681 = vmatpush3.bf16.msra.mxu1 %v4021_v2 }
  0xd0   : > { %3487 = vmatmul.mubr.msk.bf16.gmra.mrb[4].mxu0 %vm677_vm8, %v3144_v7  ;;  %v1174_v2 = vor.u32 %v1173_v58, %v1170_v32  ;;  %3894 = vmatprep.subr.msk.bf16.mxu1 %vm2088_vm9, %v3203_v25 }
  0xd1   : > { %3490 = vmatprep.mubr.msk.bf16.mxu0 %vm3960_vm1, %v3958_v0 }
  0xd2   : > { %v1175_v55 = vrot.slane %v1174_v2, 4 }
  0xd4   : > { %v4525_v40 = vsel %vm4206_vm7, %v1175_v55, %v1179_v63 }
  0xd5   : > { %v3147_v35 = vcombine.low %v659_v3, %v4525_v40  ;;  %v3961_v3 = vmov 0  }
  0xd6   : > { %3421 = vmatmul.mubr.msk.bf16.gmra.mrb[4].mxu1 %vm677_vm8, %v3101_v22  ;;  %v1805_v51 = vrot.slane %v3961_v3, 7 }
  0xd7   : > { %3424 = vmatprep.mubr.msk.bf16.mxu1 %vm3960_vm1, %v3958_v0 }
  0xd8   : > { %3491 = vmatmul.mubr.msk.bf16.gmra.mrb[8].mxu0 %vm677_vm8, %v3145_v24  ;;  %v1885_v17 = vsel %vm4680_vm12, 0, %v1805_v51 }
  0xd9   : > { %3494 = vmatprep.mubr.msk.bf16.mxu0 %vm3960_vm1, %v3958_v0  ;;  %v4692_v7 = vsel %vm4684_vm15, %v1885_v17, 0 }
  0xda   : > { %v4696_v20 = vcombine.low %v4692_v7, %v4692_v7 }
  0xdc   : > { %v1950_v32 = vshrl.u32 %v4696_v20, 16  ;;  %v1953_v58 = vshll.u32 %v4696_v20, 16 }
  0xde   : > { %3425 = vmatmul.mubr.msk.bf16.gmra.mrb[8].mxu1 %vm677_vm8, %v3102_v16  ;;  %v1955_v55 = vrot.slane %v1953_v58, 5 }
  0xdf   : > { %3428 = vmatprep.mubr.msk.bf16.mxu1 %vm3960_vm1, %v3958_v0 }
  0xe0   : > { %3495 = vmatmul.mubr.msk.bf16.gmra.mrb[12].mxu0 %vm677_vm8, %v3146_v23  ;;  %v1952_v23 = vrot.slane %v1950_v32, 4 }
  0xe1   : > { %3498 = vmatprep.mubr.msk.bf16.mxu0 %vm3960_vm1, %v3958_v0 }
  0xe2   : > { %v1956_v60 = vor.u32 %v1955_v55, %v1952_v23 }
  0xe4   : > { %v1957_v29 = vrot.slane %v1956_v60, 4 }
  0xe6   : > { %3429 = vmatmul.mubr.msk.bf16.gmra.mrb[12].mxu1 %vm677_vm8, %v3103_v34 }
  0xe7   : > { %3432 = vmatprep.mubr.msk.bf16.mxu1 %vm3960_vm1, %v3958_v0 }
  0xe8   : > { %3499 = vmatmul.mubr.msk.bf16.gmra.mrb[16].mxu0 %vm677_vm8, %v3147_v35 }
  0xe9   : > { %3504 = vmatprep.mubr.msk.bf16.mxu0 %vm3960_vm1, %v3958_v0 }
  0xee   : > { %3433 = vmatmul.mubr.msk.bf16.gmra.mrb[16].mxu1 %vm677_vm8, %v3104_v15 }
  0xef   : > { %3442 = vmatprep.mubr.msk.bf16.mxu1 %vm3960_vm1, %v3958_v0 }
  0xf0   : > { %3505 = vmatmul.mubr.msk.bf16.vlgmr.msra.gmra.mrb[0].mxu0 %vm677_vm8, %v3155_v48  ;;  %v1618_v48 = vsel %vm693_vm0, %v3180_v43, 0  ;;  %vm2075_vm0 = vcmask 64512  }
  0xf1   : > { %3525 = vmatpush3.bf16.msra.mxu0 %v1413_v50  ;;  %3508 = vmatprep.mubr.msk.bf16.mxu0 %vm3960_vm1, %v3958_v0 }
  0xf2   : > { %3546 = vmatprep.subr.bf16.mxu0 %v3958_v0 }
  0xf6   : > { %3443 = vmatmul.mubr.msk.bf16.vlgmr.msra.gmra.mrb[4].mxu1 %vm677_vm8, %v4329_v28 }
  0xf7   : > { %3446 = vmatprep.mubr.msk.bf16.mxu1 %vm3960_vm1, %v3958_v0  ;;  %3591 = vmatpush3.bf16.msra.mxu1 %v2090_v36 }
  0xf8   : > { %3509 = vmatmul.mubr.msk.bf16.gmra.mrb[4].mxu0 %vm677_vm8, %v3156_v19  ;;  %3895 = vmatprep.subr.msk.bf16.mxu1 %vm2088_vm9, %v1908_v53 }
  0xf9   : > { %3512 = vmatprep.mubr.msk.bf16.mxu0 %vm3960_vm1, %v3958_v0 }
  0xfe   : > { %3447 = vmatmul.mubr.msk.bf16.gmra.mrb[8].mxu1 %vm677_vm8, %v4438_v33 }
  0xff   : > { %3450 = vmatprep.mubr.msk.bf16.mxu1 %vm3960_vm1, %v3958_v0 }
 0x100   : > { %3513 = vmatmul.mubr.msk.bf16.gmra.mrb[8].mxu0 %vm677_vm8, %v3157_v12 }
 0x101   : > { %3516 = vmatprep.mubr.msk.bf16.mxu0 %vm3960_vm1, %v3958_v0 }
 0x106   : > { %3451 = vmatmul.mubr.msk.bf16.gmra.mrb[12].mxu1 %vm677_vm8, %v4444_v6 }
 0x107   : > { %3454 = vmatprep.mubr.msk.bf16.mxu1 %vm3960_vm1, %v3958_v0 }
 0x108   : > { %3517 = vmatmul.mubr.msk.bf16.gmra.mrb[12].mxu0 %vm677_vm8, %v3158_v30 }
 0x109   : > { %3520 = vmatprep.mubr.msk.bf16.mxu0 %vm3960_vm1, %v3958_v0 }
 0x10e   : > { %3455 = vmatmul.mubr.msk.bf16.gmra.mrb[16].mxu1 %vm677_vm8, %v4450_v57 }
 0x110   : > { %3521 = vmatmul.mubr.msk.bf16.gmra.mrb[16].mxu0 %vm677_vm8, %v3159_v45 }
 0x111   : > { %3526 = vmatprep.mubr.msk.bf16.mxu0 %vm3960_vm1, %v3958_v0 }
 0x118   : > { %3527 = vmatmul.mubr.msk.bf16.vlgmr.msra.gmra.mrb[0].mxu0 %vm677_vm8, %v3101_v22 }
 0x119   : > { %3547 = vmatpush3.bf16.msra.mxu0 %v1520_v56  ;;  %3530 = vmatprep.mubr.msk.bf16.mxu0 %vm3960_vm1, %v3958_v0 }
 0x11a   : > { %3568 = vmatprep.subr.bf16.mxu0 %v3958_v0 }
 0x120   : > { %3531 = vmatmul.mubr.msk.bf16.gmra.mrb[4].mxu0 %vm677_vm8, %v3102_v16 }
 0x121   : > { %3534 = vmatprep.mubr.msk.bf16.mxu0 %vm3960_vm1, %v3958_v0 }
 0x128   : > { %3535 = vmatmul.mubr.msk.bf16.gmra.mrb[8].mxu0 %vm677_vm8, %v3103_v34  ;;  %v4702_v34 = vcombine.high %v4692_v7, %v4692_v7 }
 0x129   : > { %3538 = vmatprep.mubr.msk.bf16.mxu0 %vm3960_vm1, %v3958_v0 }
 0x12a   : > { %v1959_v56 = vshll.u32 %v4702_v34, 16 }
 0x130   : > { %3539 = vmatmul.mubr.msk.bf16.gmra.mrb[12].mxu0 %vm677_vm8, %v3104_v15 }
 0x131   : > { %3542 = vmatprep.mubr.msk.bf16.mxu0 %vm3960_vm1, %v3958_v0 }
 0x138   : > { %3543 = vmatmul.mubr.msk.bf16.gmra.mrb[16].mxu0 %vm677_vm8, %v3166_v10 }
 0x139   : > { %3548 = vmatprep.mubr.msk.bf16.mxu0 %vm3960_vm1, %v3958_v0 }
 0x140   : > { %3549 = vmatmul.mubr.msk.bf16.vlgmr.msra.gmra.mrb[0].mxu0 %vm677_vm8, %v4348_v49  ;;  %v1508_v49 = vshll.u32 %v4407_v62, 16 }
 0x141   : > { %3569 = vmatpush3.bf16.msra.mxu0 %v1618_v48  ;;  %3552 = vmatprep.mubr.msk.bf16.mxu0 %vm3960_vm1, %v3958_v0 }
 0x142   : > { %v1510_v38 = vrot.slane %v1508_v49, 5 }
 0x144   : > { %v1511_v59 = vsel %vm4206_vm7, %v1506_v26, %v1510_v38  ;;  %v1961_v38 = vrot.slane %v1959_v56, 5 }
 0x146   : > { %v4724_v36 = vsel %vm4206_vm7, %v1957_v29, %v1961_v38 }
 0x148   : > { %3553 = vmatmul.mubr.msk.bf16.gmra.mrb[4].mxu0 %vm677_vm8, %v4401_v47  ;;  %v3173_v47 = vcombine.low %v4525_v40, %v1511_v59 }
 0x149   : > { %3556 = vmatprep.mubr.msk.bf16.mxu0 %vm3960_vm1, %v3958_v0 }
 0x150   : > { %3557 = vmatmul.mubr.msk.bf16.gmra.mrb[8].mxu0 %vm677_vm8, %v4454_v8 }
 0x151   : > { %3560 = vmatprep.mubr.msk.bf16.mxu0 %vm3960_vm1, %v3958_v0 }
 0x158   : > { %3561 = vmatmul.mubr.msk.bf16.gmra.mrb[12].mxu0 %vm677_vm8, %v4478_v52 }
 0x159   : > { %3564 = vmatprep.mubr.msk.bf16.mxu0 %vm3960_vm1, %v3958_v0 }
 0x160   : > { %3565 = vmatmul.mubr.msk.bf16.gmra.mrb[16].mxu0 %vm677_vm8, %v3173_v47 }
 0x161   : > { %3570 = vmatprep.mubr.msk.bf16.mxu0 %vm3960_vm1, %v3958_v0 }
 0x168   : > { %3571 = vmatmul.mubr.msk.bf16.vlgmr.msra.gmra.mrb[0].mxu0 %vm677_vm8, %v4329_v28 }
 0x169   : > { %3574 = vmatprep.mubr.msk.bf16.mxu0 %vm3960_vm1, %v3958_v0 }
 0x170   : > { %3575 = vmatmul.mubr.msk.bf16.gmra.mrb[4].mxu0 %vm677_vm8, %v4438_v33 }
 0x171   : > { %3578 = vmatprep.mubr.msk.bf16.mxu0 %vm3960_vm1, %v3958_v0 }
 0x178   : > { %3579 = vmatmul.mubr.msk.bf16.gmra.mrb[8].mxu0 %vm677_vm8, %v4444_v6 }
 0x179   : > { %3582 = vmatprep.mubr.msk.bf16.mxu0 %vm3960_vm1, %v3958_v0 }
 0x180   : > { %3583 = vmatmul.mubr.msk.bf16.gmra.mrb[12].mxu0 %vm677_vm8, %v4450_v57 }
 0x181   : > { %3586 = vmatprep.mubr.msk.bf16.mxu0 %vm3960_vm1, %v3958_v0 }
 0x188   : > { %3587 = vmatmul.mubr.msk.bf16.gmra.mrb[16].mxu0 %vm677_vm8, %v3181_v9 }
 0x1a1   : > { %v847_v28 = vpop.f32.mrb[0].mxu1 }
 0x1a2   : > { %v3418_v62 = vpop.f32.mrb[1].mxu1 }
 0x1a3   : > { %v850_v4 = vpop.f32.mrb[2].mxu1 }
 0x1a4   : > { %v3419_v5 = vpop.f32.mrb[3].mxu1 }
 0x1a5   : > { %v3220_v5 = vrot.slane %v4696_v20, 9 }
 0x1c9   : > { %v1016_v46 = vpop.f32.mrb[4].mxu1 }
 0x1ca   : > { %v3444_v19 = vpop.f32.mrb[5].mxu1 }
 0x1cb   : > { %v1019_v33 = vpop.f32.mrb[6].mxu1 }
 0x1cc   : > { %v3445_v12 = vpop.f32.mrb[7].mxu1 }
 0x1d1   : > { %v4661_v6 = vpop.f32.mrb[8].mxu1 }
 0x1d2   : > { %v3448_v30 = vpop.f32.mrb[9].mxu1 }
 0x1d3   : > { %v4663_v57 = vpop.f32.mrb[10].mxu1 }
 0x1d4   : > { %v3449_v45 = vpop.f32.mrb[11].mxu1 }
 0x1d9   : > { %v4665_v0 = vpop.f32.mrb[12].mxu1 }
 0x1da   : > { %v3452_v21 = vpop.f32.mrb[13].mxu1 }
 0x1db   : > { %v4667_v11 = vpop.f32.mrb[14].mxu1 }
 0x1dc   : > { %v3453_v8 = vpop.f32.mrb[15].mxu1 }
 0x1e1   : > { %v4674_v54 = vpop.f32.mrb[16].mxu1 }
 0x1e2   : > { %v3456_v37 = vpop.f32.mrb[17].mxu1 }
 0x1e3   : > { %v1043_v61 = vpop.f32.mrb[18].mxu1  ;;  %v4727_v37 = vsel %vm2088_vm9, %v1908_v53, 0 }
 0x1e4   : > { %v3457_v9 = vpop.f32.mrb[19].mxu1 }
 0x23b   : > { %v1654_v18 = vpop.f32.mrb[0].mxu0 }
 0x23c   : > { %v3572_v22 = vpop.f32.mrb[1].mxu0 }
 0x23d   : > { %v1657_v24 = vpop.f32.mrb[2].mxu0 }
 0x23e   : > { %v3682_v2 = vadd.f32 %v1657_v24, %v850_v4  ;;  %v3573_v42 = vpop.f32.mrb[3].mxu0 }
 0x240   : > { %v1704_v16 = vmax.f32 %v3682_v2, 0.0 }
 0x242   : > { %v1793_v63 = vpack.c.bf16 %v1704_v16, %v1704_v16 }
 0x243   : > { %v1662_v40 = vpop.f32.mrb[4].mxu0 }
 0x244   : > { %v1810_v35 = vshrl.u32 %v1793_v63, 16  ;;  %v3683_v39 = vadd.f32 %v1662_v40, %v1016_v46  ;;  %v3576_v15 = vpop.f32.mrb[5].mxu0  ;;  %v1813_v43 = vshll.u32 %v1793_v63, 16  ;;  %v2243_v46 = vrot.slane %v4702_v34, 5 }
 0x245   : > { %v1665_v50 = vpop.f32.mrb[6].mxu0 }
 0x246   : > { %v1812_v10 = vrot.slane %v1810_v35, 7  ;;  %v1705_v48 = vmax.f32 %v3683_v39, 0.0  ;;  %v3684_v14 = vadd.f32 %v1665_v50, %v1019_v33  ;;  %v3577_v31 = vpop.f32.mrb[7].mxu0 }
 0x248   : > { %v1815_v27 = vor.u32 %v1813_v43, %v1812_v10  ;;  %v1794_v44 = vpack.c.bf16 %v1705_v48, %v1705_v48  ;;  %v1706_v49 = vmax.f32 %v3684_v14, 0.0 }
 0x24a   : > { %v1886_v26 = vsel %vm4680_vm12, 0, %v1815_v27  ;;  %v1817_v59 = vshrl.u32 %v1794_v44, 16  ;;  %v1795_v47 = vpack.c.bf16 %v1706_v49, %v1706_v49  ;;  %v1820_v62 = vshll.u32 %v1794_v44, 16 }
 0x24b   : > { %v4709_v28 = vsel %vm4684_vm15, %v1886_v26, 0  ;;  %v1670_v4 = vpop.f32.mrb[8].mxu0 }
 0x24c   : > { %v4715_v19 = vcombine.low %v4709_v28, %v4709_v28  ;;  %v4719_v33 = vcombine.high %v4709_v28, %v4709_v28  ;;  %v1819_v12 = vrot.slane %v1817_v59, 7  ;;  %v1824_v30 = vshrl.u32 %v1795_v47, 16  ;;  %v3580_v45 = vpop.f32.mrb[9].mxu0 }
 0x24d   : > { %v1827_v21 = vshll.u32 %v1795_v47, 16  ;;  %v3685_v8 = vadd.f32 %v1670_v4, %v4661_v6  ;;  %v1673_v25 = vpop.f32.mrb[10].mxu0  ;;  %v3212_v24 = vcombine.low %v4692_v7, %v4709_v28 }
 0x24e   : > { %v1822_v61 = vor.u32 %v1820_v62, %v1819_v12  ;;  %v1826_v9 = vrot.slane %v1824_v30, 7  ;;  %v3686_v3 = vadd.f32 %v1673_v25, %v4663_v57  ;;  %v3581_v51 = vpop.f32.mrb[11].mxu0  ;;  %v1964_v17 = vshrl.u32 %v4715_v19, 16 }
 0x24f   : > { %v1707_v18 = vmax.f32 %v3685_v8, 0.0  ;;  %v1967_v22 = vshll.u32 %v4715_v19, 16  ;;  %v1973_v6 = vshll.u32 %v4719_v33, 16  ;;  %v3221_v23 = vrot.slane %v4715_v19, 9 }
 0x250   : > { %v1887_v32 = vsel %vm4680_vm12, 0, %v1822_v61  ;;  %v1829_v53 = vor.u32 %v1827_v21, %v1826_v9  ;;  %v1708_v58 = vmax.f32 %v3686_v3, 0.0  ;;  %v1966_v2 = vrot.slane %v1964_v17, 4 }
 0x251   : > { %v4739_v57 = vsel %vm4684_vm15, %v1887_v32, 0  ;;  %v1796_v42 = vpack.c.bf16 %v1707_v18, %v1707_v18  ;;  %v1969_v16 = vrot.slane %v1967_v22, 5  ;;  %v1975_v35 = vrot.slane %v1973_v6, 5 }
 0x252   : > { %v4744_v55 = vcombine.low %v4739_v57, %v4739_v57  ;;  %v4748_v63 = vcombine.high %v4739_v57, %v4739_v57  ;;  %v1888_v40 = vsel %vm4680_vm12, 0, %v1829_v53  ;;  %v1797_v60 = vpack.c.bf16 %v1708_v58, %v1708_v58 }
 0x253   : > { %v4754_v39 = vsel %vm4684_vm15, %v1888_v40, 0  ;;  %v1831_v15 = vshrl.u32 %v1796_v42, 16  ;;  %v1834_v50 = vshll.u32 %v1796_v42, 16  ;;  %v1678_v56 = vpop.f32.mrb[12].mxu0  ;;  %v1970_v31 = vor.u32 %v1969_v16, %v1966_v2 }
 0x254   : > { %v1978_v10 = vshrl.u32 %v4744_v55, 16  ;;  %v1981_v43 = vshll.u32 %v4744_v55, 16  ;;  %v1987_v48 = vshll.u32 %v4748_v63, 16  ;;  %v3584_v14 = vpop.f32.mrb[13].mxu0  ;;  %v3222_v27 = vrot.slane %v4744_v55, 9 }
 0x255   : > { %v4762_v44 = vcombine.low %v4754_v39, %v4754_v39  ;;  %v4766_v49 = vcombine.high %v4754_v39, %v4754_v39  ;;  %v4770_v29 = vcombine.low %v4739_v57, %v4754_v39  ;;  %v1681_v38 = vpop.f32.mrb[14].mxu0  ;;  %v2251_v47 = vrot.slane %v4748_v63, 5 }
 0x256   : > { %v1980_v26 = vrot.slane %v1978_v10, 4  ;;  %v1983_v59 = vrot.slane %v1981_v43, 5  ;;  %v1833_v62 = vrot.slane %v1831_v15, 7  ;;  %v3585_v4 = vpop.f32.mrb[15].mxu0  ;;  %v1989_v12 = vrot.slane %v1987_v48, 5 }
 0x257   : > { %v1992_v30 = vshrl.u32 %v4762_v44, 16  ;;  %v1995_v45 = vshll.u32 %v4762_v44, 16  ;;  %v2001_v21 = vshll.u32 %v4766_v49, 16  ;;  %v3223_v25 = vrot.slane %v4762_v44, 9 }
 0x258   : > { %v1984_v8 = vor.u32 %v1983_v59, %v1980_v26  ;;  %v1836_v61 = vor.u32 %v1834_v50, %v1833_v62  ;;  %v1838_v9 = vshrl.u32 %v1797_v60, 16  ;;  %v1841_v18 = vshll.u32 %v1797_v60, 16 }
 0x259   : > { %v1994_v3 = vrot.slane %v1992_v30, 4  ;;  %v1997_v51 = vrot.slane %v1995_v45, 5  ;;  %v2003_v17 = vrot.slane %v2001_v21, 5  ;;  %v3687_v53 = vadd.f32 %v1678_v56, %v4665_v0 }
 0x25a   : > { %v1985_v22 = vrot.slane %v1984_v8, 4  ;;  %v1889_v6 = vsel %vm4680_vm12, 0, %v1836_v61  ;;  %v1840_v32 = vrot.slane %v1838_v9, 7  ;;  %v3688_v42 = vadd.f32 %v1681_v38, %v4667_v11 }
 0x25b   : > { %v1998_v58 = vor.u32 %v1997_v51, %v1994_v3  ;;  %v4782_v2 = vsel %vm4684_vm15, %v1889_v6, 0  ;;  %v1971_v16 = vrot.slane %v1970_v31, 4  ;;  %v1686_v40 = vpop.f32.mrb[16].mxu0  ;;  %v1709_v43 = vmax.f32 %v3687_v53, 0.0 }
 0x25c   : > { %v4787_v15 = vcombine.low %v4782_v2, %v4782_v2  ;;  %v4791_v50 = vcombine.high %v4782_v2, %v4782_v2  ;;  %v3239_v0 = vcombine.low %v4754_v39, %v4782_v2  ;;  %v1843_v60 = vor.u32 %v1841_v18, %v1840_v32  ;;  %v3588_v56 = vpop.f32.mrb[17].mxu0 }
 0x25d   : > { %v1999_v10 = vrot.slane %v1998_v58, 4  ;;  %v1710_v48 = vmax.f32 %v3688_v42, 0.0  ;;  %v4797_v11 = vsel %vm4206_vm7, %v1971_v16, %v1975_v35  ;;  %v1689_v14 = vpop.f32.mrb[18].mxu0  ;;  %v3689_v26 = vadd.f32 %v1686_v40, %v4674_v54 }
 0x25e   : > { %v1890_v31 = vsel %vm4680_vm12, 0, %v1843_v60  ;;  %v3204_v38 = vcombine.low %v4724_v36, %v4797_v11  ;;  %v3589_v59 = vpop.f32.mrb[19].mxu0  ;;  %v4806_v62 = vsel %vm4206_vm7, %v1985_v22, %v1989_v12  ;;  %v1798_v35 = vpack.c.bf16 %v1709_v43, %v1709_v43 }
 0x25f   : > { %v4810_v4 = vsel %vm4684_vm15, %v1890_v31, 0  ;;  %v1799_v30 = vpack.c.bf16 %v1710_v48, %v1710_v48  ;;  %v4814_v45 = vsel %vm4206_vm7, %v1999_v10, %v2003_v17  ;;  %v1711_v12 = vmax.f32 %v3689_v26, 0.0  ;;  %v4832_v17 = vld [vmem:[%s5130_s3 + $0x8] sm:$0xf] }
 0x260   : > { %v4818_v21 = vcombine.low %v4810_v4, %v4810_v4  ;;  %v4822_v54 = vcombine.high %v4810_v4, %v4810_v4  ;;  %3592 = vmatprep.mubr.msk.bf16.mxu1 %vm2075_vm0, %v3204_v38  ;;  %v4827_v8 = vcombine.low %v4806_v62, %v4814_v45  ;;  %v1845_v61 = vshrl.u32 %v1798_v35, 16 }
 0x261   : > { %v1848_v9 = vshll.u32 %v1798_v35, 16  ;;  %v1852_v3 = vshrl.u32 %v1799_v30, 16  ;;  %v1855_v51 = vshll.u32 %v1799_v30, 16  ;;  %v1800_v18 = vpack.c.bf16 %v1711_v12, %v1711_v12 }
 0x262   : > { %3593 = vmatmul.mubr.msk.bf16.vlgmr.msra.gmra.mrb[20].mxu1 %vm2075_vm0, %v4827_v8  ;;  %v2006_v22 = vshrl.u32 %v4787_v15, 16  ;;  %v2009_v6 = vshll.u32 %v4787_v15, 16  ;;  %v2015_v32 = vshll.u32 %v4791_v50, 16  ;;  %v1847_v53 = vrot.slane %v1845_v61, 7 }
 0x263   : > { %v1854_v58 = vrot.slane %v1852_v3, 7  ;;  %v2020_v42 = vshrl.u32 %v4818_v21, 16  ;;  %v2023_v16 = vshll.u32 %v4818_v21, 16  ;;  %3601 = vmatpush3.bf16.msra.mxu1 %v4727_v37  ;;  %v2255_v40 = vrot.slane %v4766_v49, 5 }
 0x264   : > { %v1859_v60 = vshrl.u32 %v1800_v18, 16  ;;  %v2008_v56 = vrot.slane %v2006_v22, 4  ;;  %v2011_v10 = vrot.slane %v2009_v6, 5  ;;  %3896 = vmatprep.subr.msk.bf16.mxu1 %vm2088_vm9, %v4832_v17  ;;  %v1850_v43 = vor.u32 %v1848_v9, %v1847_v53 }
 0x265   : > { %v1857_v48 = vor.u32 %v1855_v51, %v1854_v58  ;;  %v1862_v14 = vshll.u32 %v1800_v18, 16  ;;  %v2017_v31 = vrot.slane %v2015_v32, 5  ;;  %v2022_v59 = vrot.slane %v2020_v42, 4 }
 0x266   : > { %v1861_v38 = vrot.slane %v1859_v60, 7  ;;  %v2012_v26 = vor.u32 %v2011_v10, %v2008_v56  ;;  %v2025_v35 = vrot.slane %v2023_v16, 5  ;;  %v1891_v30 = vsel %vm4680_vm12, 0, %v1850_v43 }
 0x267   : > { %v1892_v37 = vsel %vm4680_vm12, 0, %v1857_v48  ;;  %v2029_v49 = vshll.u32 %v4822_v54, 16  ;;  %v4852_v12 = vcombine.low %v4782_v2, %v4810_v4  ;;  %v4856_v61 = vsel %vm4684_vm15, %v1891_v30, 0  ;;  %v3275_v2 = vld [vmem:[%s5130_s3 + $0x1c] sm:$0xf] }
 0x268   : > { %v4860_v9 = vsel %vm4684_vm15, %v1892_v37, 0  ;;  %v1864_v3 = vor.u32 %v1862_v14, %v1861_v38  ;;  %v2013_v51 = vrot.slane %v2012_v26, 4  ;;  %v3199_v18 = vcombine.low %v4856_v61, %v4856_v61 }
 0x269   : > { %v3200_v22 = vcombine.high %v4856_v61, %v4856_v61  ;;  %v3201_v6 = vcombine.low %v4860_v9, %v4860_v9  ;;  %v2247_v32 = vrot.slane %v4719_v33, 5  ;;  %v3202_v53 = vcombine.high %v4860_v9, %v4860_v9 }
 0x26a   : > { %v1893_v58 = vsel %vm4680_vm12, 0, %v1864_v3  ;;  %v4875_v42 = vsel %vm4206_vm7, %v2013_v51, %v2017_v31  ;;  %v2026_v16 = vor.u32 %v2025_v35, %v2022_v59  ;;  %v2034_v10 = vshrl.u32 %v3199_v18, 16 }
 0x26b   : > { %v4879_v60 = vsel %vm4684_vm15, %v1893_v58, 0  ;;  %v3250_v56 = vcombine.low %v4814_v45, %v4875_v42  ;;  %v2037_v33 = vshll.u32 %v3199_v18, 16  ;;  %v2031_v48 = vrot.slane %v2029_v49, 5  ;;  %v3282_v45 = vld [vmem:[%s5130_s3 + $0x20] sm:$0xf] }
 0x26c   : > { %v4885_v43 = vcombine.low %v4879_v60, %v4879_v60  ;;  %v2027_v52 = vrot.slane %v2026_v16, 4  ;;  %v2043_v14 = vshll.u32 %v3200_v22, 16  ;;  %v2036_v38 = vrot.slane %v2034_v10, 4 }
 0x26d   : > { %v2039_v31 = vrot.slane %v2037_v33, 5  ;;  %v2048_v26 = vshrl.u32 %v3201_v6, 16  ;;  %v2051_v59 = vshll.u32 %v3201_v6, 16  ;;  %v3247_v1 = vcombine.high %v4879_v60, %v4879_v60 }
 0x26e   : > { %v4891_v35 = vsel %vm4206_vm7, %v2027_v52, %v2031_v48  ;;  %v2057_v30 = vshll.u32 %v3202_v53, 16  ;;  %v4895_v37 = vcombine.low %v4856_v61, %v4860_v9  ;;  %v2045_v16 = vrot.slane %v2043_v14, 5 }
 0x26f   : > { %v4899_v49 = vcombine.low %v4875_v42, %v4891_v35  ;;  %v2040_v3 = vor.u32 %v2039_v31, %v2036_v38  ;;  %v2050_v51 = vrot.slane %v2048_v26, 4  ;;  %v2053_v58 = vrot.slane %v2051_v59, 5 }
 0x270   : > { %v2059_v10 = vrot.slane %v2057_v30, 5  ;;  %v4907_v33 = vsel %vm4198_vm6, %v3222_v27, %v2251_v47  ;;  %v4913_v52 = vsel %vm4198_vm6, %v3223_v25, %v2255_v40  ;;  %v4921_v55 = vsel %vm4198_vm6, %v3221_v23, %v2247_v32 }
 0x271   : > { %3596 = vmatprep.mubr.msk.bf16.mxu1 %vm2075_vm0, %v4899_v49  ;;  %v2041_v48 = vrot.slane %v2040_v3, 4  ;;  %v2054_v14 = vor.u32 %v2053_v58, %v2050_v51  ;;  %v4925_v63 = vcombine.low %v4907_v33, %v4913_v52  ;;  %v3224_v27 = vrot.slane %v4787_v15, 9 }
 0x272   : > { %v2259_v44 = vrot.slane %v4791_v50, 5  ;;  %v3225_v47 = vrot.slane %v4818_v21, 9  ;;  %v2263_v25 = vrot.slane %v4822_v54, 5  ;;  %v3226_v38 = vrot.slane %v3199_v18, 9 }
 0x273   : > { %v4933_v40 = vsel %vm4206_vm7, %v2041_v48, %v2045_v16  ;;  %v2055_v19 = vrot.slane %v2054_v14, 4  ;;  %v2267_v23 = vrot.slane %v3200_v22, 5  ;;  %v3227_v50 = vrot.slane %v3201_v6, 9 }
 0x274   : > { %v4937_v32 = vsel %vm4198_vm6, %v3224_v27, %v2259_v44  ;;  %v4941_v15 = vsel %vm4198_vm6, %v3225_v47, %v2263_v25  ;;  %v2271_v31 = vrot.slane %v3202_v53, 5  ;;  %v3238_v53 = vcombine.low %v4709_v28, %v4739_v57  ;;  %v3248_v27 = vld [vmem:[%s5130_s3 + $0x10] sm:$0xf]  ;;  %v3267_v47 = vld [vmem:[%s5130_s3 + $0x18] sm:$0xf] }
 0x275   : > { %v4945_v21 = vsel %vm4206_vm7, %v2055_v19, %v2059_v10  ;;  %v4949_v54 = vcombine.low %v4937_v32, %v4941_v15  ;;  %v3260_v18 = vcombine.low %v4913_v52, %v4937_v32  ;;  %v4955_v22 = vsel %vm4198_vm6, %v3226_v38, %v2267_v23 }
 0x276   : > { %v4959_v26 = vcombine.low %v4933_v40, %v4945_v21  ;;  %v4963_v6 = vsel %vm4198_vm6, %v3227_v50, %v2271_v31  ;;  %v3240_v59 = vcombine.low %v4810_v4, %v4856_v61  ;;  %v3241_v3 = vcombine.low %v4860_v9, %v4879_v60 }
 0x277   : > { %v4971_v30 = vcombine.low %v4955_v22, %v4963_v6  ;;  %v3249_v51 = vcombine.low %v4797_v11, %v4806_v62  ;;  %v3251_v58 = vcombine.low %v4891_v35, %v4933_v40  ;;  %v2475_v57 = vshrl.u32 %v4885_v43, 16 }
 0x278   : > { %3597 = vmatmul.mubr.msk.bf16.gmra.mrb[24].mxu1 %vm2075_vm0, %v4959_v26  ;;  %v2478_v4 = vshll.u32 %v4885_v43, 16  ;;  %v3259_v61 = vcombine.low %v4921_v55, %v4907_v33  ;;  %v3261_v11 = vcombine.low %v4941_v15, %v4955_v22  ;;  %v3257_v62 = vrot.slane %v4885_v43, 9 }
 0x279   : > { %3602 = vmatprep.mubr.msk.bf16.mxu1 %vm2075_vm0, %v3212_v24  ;;  %v2585_v9 = vrot.slane %v3247_v1, 5  ;;  %v2477_v35 = vrot.slane %v2475_v57, 4  ;;  %v2484_v10 = vshll.u32 %v3247_v1, 16  ;;  %v4998_v33 = vsel %vm4198_vm6, %v3220_v5, %v2243_v46  ;;  %v3237_v5 = vld [vmem:[%s5130_s3 + $0xc] sm:$0xf] }
 0x27a   : > { %v2480_v16 = vrot.slane %v2478_v4, 5  ;;  %v2300_v34 = vsel %vm2088_vm9, %v4832_v17, 0  ;;  %v3229_v14 = vcombine.low %v4998_v33, %v4921_v55  ;;  %v2396_v13 = vsel %vm2088_vm9, %v3237_v5, 0  ;;  %v3258_v55 = vld [vmem:[%s5130_s3 + $0x14] sm:$0xf] }
 0x27b   : > { %v5002_v28 = vsel %vm4198_vm6, %v3257_v62, %v2585_v9  ;;  %v2486_v20 = vrot.slane %v2484_v10, 5  ;;  %v2607_v44 = vsel %vm2088_vm9, %v3258_v55, 0  ;;  %v2691_v39 = vsel %vm2088_vm9, %v3267_v47, 0 }
 0x27c   : > { %v2481_v24 = vor.u32 %v2480_v16, %v2477_v35  ;;  %v3262_v43 = vcombine.low %v4963_v6, %v5002_v28  ;;  %v3283_v48 = vcombine.low %v5002_v28, %v4998_v33  ;;  %v3268_v42 = vcombine.low %v4879_v60, %v4692_v7 }
 0x27e   : > { %v2482_v1 = vrot.slane %v2481_v24, 4 }
 0x280   : > { %3603 = vmatmul.mubr.msk.bf16.vlgmr.msra.gmra.mrb[20].mxu1 %vm2075_vm0, %v4770_v29  ;;  %v2487_v41 = vsel %vm4206_vm7, %v2482_v1, %v2486_v20 }
 0x281   : > { %3611 = vmatpush3.bf16.msra.mxu1 %v2300_v34  ;;  %3606 = vmatprep.mubr.msk.bf16.mxu1 %vm2075_vm0, %v4852_v12  ;;  %v3252_v46 = vcombine.low %v4945_v21, %v2487_v41  ;;  %v3276_v17 = vcombine.low %v2487_v41, %v4724_v36  ;;  %v2508_v36 = vsel %vm2088_vm9, %v3248_v27, 0 }
 0x282   : > { %3897 = vmatprep.subr.msk.bf16.mxu1 %vm2088_vm9, %v3237_v5 }
 0x288   : > { %3607 = vmatmul.mubr.msk.bf16.gmra.mrb[24].mxu1 %vm2075_vm0, %v4895_v37 }
 0x289   : > { %3612 = vmatprep.mubr.msk.bf16.mxu1 %vm2075_vm0, %v3229_v14 }
 0x290   : > { %3613 = vmatmul.mubr.msk.bf16.vlgmr.msra.gmra.mrb[20].mxu1 %vm2075_vm0, %v4925_v63 }
 0x291   : > { %3621 = vmatpush3.bf16.msra.mxu1 %v2396_v13  ;;  %3616 = vmatprep.mubr.msk.bf16.mxu1 %vm2075_vm0, %v4949_v54 }
 0x292   : > { %3898 = vmatprep.subr.msk.bf16.mxu1 %vm2088_vm9, %v3248_v27 }
 0x298   : > { %3617 = vmatmul.mubr.msk.bf16.gmra.mrb[24].mxu1 %vm2075_vm0, %v4971_v30 }
 0x299   : > { %3622 = vmatprep.mubr.msk.bf16.mxu1 %vm2075_vm0, %v3238_v53 }
 0x2a0   : > { %3623 = vmatmul.mubr.msk.bf16.vlgmr.msra.gmra.mrb[20].mxu1 %vm2075_vm0, %v3239_v0  ;;  %v2791_v0 = vsel %vm2088_vm9, %v3275_v2, 0 }
 0x2a1   : > { %3631 = vmatpush3.bf16.msra.mxu1 %v2508_v36  ;;  %3626 = vmatprep.mubr.msk.bf16.mxu1 %vm2075_vm0, %v3240_v59 }
 0x2a2   : > { %3899 = vmatprep.subr.msk.bf16.mxu1 %vm2088_vm9, %v3258_v55 }
 0x2a8   : > { %3627 = vmatmul.mubr.msk.bf16.gmra.mrb[24].mxu1 %vm2075_vm0, %v3241_v3 }
 0x2a9   : > { %3632 = vmatprep.mubr.msk.bf16.mxu1 %vm2075_vm0, %v3249_v51 }
 0x2b0   : > { %3633 = vmatmul.mubr.msk.bf16.vlgmr.msra.gmra.mrb[20].mxu1 %vm2075_vm0, %v3250_v56 }
 0x2b1   : > { %3641 = vmatpush3.bf16.msra.mxu1 %v2607_v44  ;;  %3636 = vmatprep.mubr.msk.bf16.mxu1 %vm2075_vm0, %v3251_v58 }
 0x2b2   : > { %3900 = vmatprep.subr.msk.bf16.mxu1 %vm2088_vm9, %v3267_v47 }
 0x2b8   : > { %3637 = vmatmul.mubr.msk.bf16.gmra.mrb[24].mxu1 %vm2075_vm0, %v3252_v46 }
 0x2b9   : > { %3642 = vmatprep.mubr.msk.bf16.mxu1 %vm2075_vm0, %v3259_v61 }
 0x2c0   : > { %3643 = vmatmul.mubr.msk.bf16.vlgmr.msra.gmra.mrb[20].mxu1 %vm2075_vm0, %v3260_v18 }
 0x2c1   : > { %3651 = vmatpush3.bf16.msra.mxu1 %v2691_v39  ;;  %3646 = vmatprep.mubr.msk.bf16.mxu1 %vm2075_vm0, %v3261_v11 }
 0x2c2   : > { %3901 = vmatprep.subr.msk.bf16.mxu1 %vm2088_vm9, %v3275_v2 }
 0x2c8   : > { %3647 = vmatmul.mubr.msk.bf16.gmra.mrb[24].mxu1 %vm2075_vm0, %v3262_v43 }
 0x2c9   : > { %3652 = vmatprep.mubr.msk.bf16.mxu1 %vm2075_vm0, %v4770_v29  ;;  %v2878_v29 = vsel %vm2088_vm9, %v3282_v45, 0 }
 0x2d0   : > { %3653 = vmatmul.mubr.msk.bf16.vlgmr.msra.gmra.mrb[20].mxu1 %vm2075_vm0, %v4852_v12 }
 0x2d1   : > { %3661 = vmatpush3.bf16.msra.mxu1 %v2791_v0  ;;  %3656 = vmatprep.mubr.msk.bf16.mxu1 %vm2075_vm0, %v4895_v37 }
 0x2d2   : > { %3902 = vmatprep.subr.msk.bf16.mxu1 %vm2088_vm9, %v3282_v45 }
 0x2d8   : > { %3657 = vmatmul.mubr.msk.bf16.gmra.mrb[24].mxu1 %vm2075_vm0, %v3268_v42 }
 0x2d9   : > { %3662 = vmatprep.mubr.msk.bf16.mxu1 %vm2075_vm0, %v4827_v8 }
 0x2e0   : > { %3663 = vmatmul.mubr.msk.bf16.vlgmr.msra.gmra.mrb[20].mxu1 %vm2075_vm0, %v4899_v49 }
 0x2e1   : > { %3671 = vmatpush3.bf16.msra.mxu1 %v2878_v29  ;;  %3666 = vmatprep.mubr.msk.bf16.mxu1 %vm2075_vm0, %v4959_v26 }
 0x2e8   : > { %3667 = vmatmul.mubr.msk.bf16.gmra.mrb[24].mxu1 %vm2075_vm0, %v3276_v17 }
 0x2e9   : > { %3672 = vmatprep.mubr.msk.bf16.mxu1 %vm2075_vm0, %v4925_v63 }
 0x2f0   : > { %3673 = vmatmul.mubr.msk.bf16.vlgmr.msra.gmra.mrb[20].mxu1 %vm2075_vm0, %v4949_v54 }
 0x2f1   : > { %3676 = vmatprep.mubr.msk.bf16.mxu1 %vm2075_vm0, %v4971_v30 }
 0x2f8   : > { %3677 = vmatmul.mubr.msk.bf16.gmra.mrb[24].mxu1 %vm2075_vm0, %v3283_v48 }
 0x3c3   : > { %v3674_v7 = vpop.f32.mrb[20].mxu1 }
 0x3c4   : > { %v2955_v8 = vmax.f32 %v3674_v7, 0.0  ;;  %v2914_v12 = vpop.f32.mrb[21].mxu1 }
 0x3c5   : > { %v2953_v60 = vmax.f32 %v2914_v12, 0.0  ;;  %v3675_v56 = vpop.f32.mrb[22].mxu1 }
 0x3c6   : > { %2963 = vst.msk [vmem:[%s321_s23 + $0x10] sm:$0xff] %vm2075_vm0, %v2955_v8  ;;  %v2956_v37 = vmax.f32 %v3675_v56, 0.0  ;;  %v2917_v49 = vpop.f32.mrb[23].mxu1 }
 0x3c7   : > { %2961 = vst.msk [vmem:[%s321_s23] sm:$0xff] %vm2075_vm0, %v2953_v60  ;;  %v2954_v52 = vmax.f32 %v2917_v49, 0.0 }
 0x3c8   : > { %2964 = vst.msk [vmem:[%s321_s23 + $0x18] sm:$0xff] %vm2075_vm0, %v2956_v37 }
 0x3c9   : > { %2962 = vst.msk [vmem:[%s321_s23 + $0x8] sm:$0xff] %vm2075_vm0, %v2954_v52 }
 0x3cb   : > { %v3678_v63 = vpop.f32.mrb[24].mxu1 }
 0x3cc   : > { %v2959_v25 = vmax.f32 %v3678_v63, 0.0  ;;  %v2930_v40 = vpop.f32.mrb[25].mxu1 }
 0x3cd   : > { %v2957_v19 = vmax.f32 %v2930_v40, 0.0  ;;  %v3679_v38 = vpop.f32.mrb[26].mxu1 }
 0x3ce   : > { %2967 = vst.msk [vmem:[%s321_s23 + $0x30] sm:$0xff] %vm2075_vm0, %v2959_v25  ;;  %v2960_v23 = vmax.f32 %v3679_v38, 0.0  ;;  %v2933_v32 = vpop.f32.mrb[27].mxu1 }
 0x3cf   : > { %2965 = vst.msk [vmem:[%s321_s23 + $0x20] sm:$0xff] %vm2075_vm0, %v2957_v19  ;;  %v2958_v15 = vmax.f32 %v2933_v32, 0.0 }
 0x3d0   : > { %2968 = vst.msk [vmem:[%s321_s23 + $0x38] sm:$0xff] %vm2075_vm0, %v2960_v23 }
 0x3d1   : > { %2966 = vst.msk [vmem:[%s321_s23 + $0x28] sm:$0xff] %vm2075_vm0, %v2958_v15 }
 0x3d2 PF: > { %s14_s17 = sadd.s32 1, %s3956_s17   ;;  %s5140_s15 = smov %s3952_s16 }
 0x3d3   : > { %p11_p5 = scmp.ge.s32.totalorder %s14_s17, 4   ;;  %s5141_s16 = smov %s5143_s18 }
 0x3d5   :  { %13 = sbr.rel (!%p11_p5) target bundleno = 2 (0x2), region = 85 }

</bundles_post_ra>
